<compile_context>
chip_gen: v6e
topology: v6e:2x2x1
jax: 0.10.0
libtpu: 0.0.40
codegen_flags: <defaults>
</compile_context>

<pallas_src>
import functools
import math

import jax
import jax.numpy as jnp
from jax import lax
from jax.experimental import pallas as pl
from jax.experimental.pallas import tpu as pltpu

NUM_HEADS = 4
_VMEM = pl.BlockSpec(memory_space=pltpu.MemorySpace.VMEM)
_SMEM = pl.BlockSpec(memory_space=pltpu.MemorySpace.SMEM)


# ----------------------------------------------------------------------------
# In-kernel helpers (traced inside the Pallas kernel bodies)
# ----------------------------------------------------------------------------
def _gcn2(x, a, w1, b1, w2, b2):
    """2-layer GCN: relu(A @ X @ W1 + b1); then A @ H @ W2 + b2."""
    f32 = jnp.float32
    h = jnp.dot(a, jnp.dot(x, w1, preferred_element_type=f32),
                preferred_element_type=f32) + b1
    h = jnp.maximum(h, 0.0)
    return jnp.dot(a, jnp.dot(h, w2, preferred_element_type=f32),
                   preferred_element_type=f32) + b2


def _piece_normalized_adjacency(src_col, dst_row, dst_col, n):
    """GCN-normalized D^-1/2 (A + I) D^-1/2 for the (tiny, per-position) piece
    graph, built with iota compares + one matmul.  No in-kernel transposes:
    the dst list is supplied in both row and column orientation, and the same
    in-degree vector is used for both normalization sides."""
    f32 = jnp.float32
    e = dst_row.shape[1]
    row_iota = lax.broadcasted_iota(jnp.int32, (n, e), 0)
    col_iota = lax.broadcasted_iota(jnp.int32, (e, n), 1)
    oh_dst = jnp.where(row_iota == dst_row, 1.0, 0.0).astype(f32)     # (n, e)
    oh_src_t = jnp.where(col_iota == src_col, 1.0, 0.0).astype(f32)   # (e, n)
    oh_dst_t = jnp.where(col_iota == dst_col, 1.0, 0.0).astype(f32)   # (e, n)
    eye = jnp.where(
        lax.broadcasted_iota(jnp.int32, (n, n), 0)
        == lax.broadcasted_iota(jnp.int32, (n, n), 1), 1.0, 0.0).astype(f32)
    adj = jnp.dot(oh_dst, oh_src_t, preferred_element_type=f32) + eye  # (n, n)
    deg_col = jnp.sum(oh_dst, axis=1, keepdims=True) + 1.0             # (n, 1)
    deg_row = jnp.sum(oh_dst_t, axis=0, keepdims=True) + 1.0           # (1, n)
    return adj * lax.rsqrt(deg_col) * lax.rsqrt(deg_row)


# ----------------------------------------------------------------------------
# Fused kernel: GCNs + cross-attention + scatter + policy/value heads
# ----------------------------------------------------------------------------
def _fused_forward_kernel(p2s_ref,                                     # SMEM (P,)
                          a_sq_ref, sq_feat_ref, pc_feat_ref,
                          pc_src_col_ref, pc_dst_row_ref, pc_dst_col_ref,
                          sq_w1_ref, sq_b1_ref, sq_w2_ref, sq_b2_ref,
                          pc_w1_ref, pc_b1_ref, pc_w2_ref, pc_b2_ref,
                          wq_ref, bq_ref, wk_ref, bk_ref, wv_ref, bv_ref,
                          wo_h_ref, bo_ref,
                          hw1_ref, hb1_ref, wp2_ref, pb2_ref, wv2_ref, vb2_ref,
                          policy_ref, value_ref, *, num_heads):
    f32 = jnp.float32
    num_pieces = pc_feat_ref.shape[0]

    # --- dual GCNs (square adjacency precomputed on the host: static board) --
    sq_emb = _gcn2(sq_feat_ref[...], a_sq_ref[...],
                   sq_w1_ref[...], sq_b1_ref[...], sq_w2_ref[...], sq_b2_ref[...])
    a_pc = _piece_normalized_adjacency(pc_src_col_ref[...], pc_dst_row_ref[...],
                                       pc_dst_col_ref[...], num_pieces)
    pc_emb = _gcn2(pc_feat_ref[...], a_pc,
                   pc_w1_ref[...], pc_b1_ref[...], pc_w2_ref[...], pc_b2_ref[...])

    # --- cross attention: full-width QKV, static per-head lane slices --------
    d = sq_emb.shape[-1]
    dh = d // num_heads
    scale = 1.0 / math.sqrt(dh)
    q = jnp.dot(pc_emb, wq_ref[...], preferred_element_type=f32) + bq_ref[...]
    k = jnp.dot(sq_emb, wk_ref[...], preferred_element_type=f32) + bk_ref[...]
    v = jnp.dot(sq_emb, wv_ref[...], preferred_element_type=f32) + bv_ref[...]

    attended = bo_ref[...]                                   # (1, D) -> bcast
    for h in range(num_heads):
        sl = slice(h * dh, (h + 1) * dh)
        qh, kh, vh = q[:, sl], k[:, sl], v[:, sl]
        s = lax.dot_general(qh, kh, (((1,), (1,)), ((), ())),
                            preferred_element_type=f32) * scale        # (P, S)
        s = s - jnp.max(s, axis=-1, keepdims=True)
        p = jnp.exp(s)
        p = p * pl.reciprocal(jnp.sum(p, axis=-1, keepdims=True), approx=True)
        ctx = jnp.dot(p, vh, preferred_element_type=f32)                # (P, dh)
        attended = attended + jnp.dot(ctx, wo_h_ref[h],
                                      preferred_element_type=f32)       # (P, D)

    # --- heads: index_add + flatten + fused first linear layer --------------
    # final_board = zeros.index_add(map, attended); flatten(final_board) @ W1
    #   == sum_p attended[p, :] @ W1_block[map[p]]   (duplicates accumulate),
    # so we gather only the piece-mapped (D, 2*hidden) blocks of the fused
    # policy|value first-layer weight (stored bf16, up-cast before the MXU).
    acc = hb1_ref[...]                                                  # (1, 2H)
    for pce in range(num_pieces):
        blk = hw1_ref[p2s_ref[pce]].astype(f32)                         # (D, 2H)
        acc = acc + jnp.dot(attended[pce:pce + 1, :], blk,
                            preferred_element_type=f32)
    hdn = jnp.maximum(acc, 0.0)                                         # (1, 2H)

    policy_ref[...] = (jnp.dot(hdn, wp2_ref[...], preferred_element_type=f32)
                       + pb2_ref[...])
    value_ref[...] = jnp.tanh(
        jnp.dot(hdn, wv2_ref[...], preferred_element_type=f32) + vb2_ref[...])


def _square_only_kernel(a_sq_ref, sq_feat_ref,
                        sq_w1_ref, sq_b1_ref, sq_w2_ref, sq_b2_ref,
                        hw1_ref, hb1_ref, wp2_ref, pb2_ref, wv2_ref, vb2_ref,
                        policy_ref, value_ref, emb_scratch):
    """Path taken when there are no pieces / no piece_to_square_map: the heads
    consume the full square embedding, so every W1 block contributes."""
    f32 = jnp.float32
    num_squares = sq_feat_ref.shape[0]
    emb_scratch[...] = _gcn2(sq_feat_ref[...], a_sq_ref[...],
                             sq_w1_ref[...], sq_b1_ref[...],
                             sq_w2_ref[...], sq_b2_ref[...])

    def body(s, acc):
        row = emb_scratch[pl.ds(s, 1), :]                               # (1, D)
        blk = hw1_ref[s].astype(f32)                                    # (D, 2H)
        return acc + jnp.dot(row, blk, preferred_element_type=f32)

    acc = lax.fori_loop(0, num_squares, body, hb1_ref[...])
    hdn = jnp.maximum(acc, 0.0)
    policy_ref[...] = (jnp.dot(hdn, wp2_ref[...], preferred_element_type=f32)
                       + pb2_ref[...])
    value_ref[...] = jnp.tanh(
        jnp.dot(hdn, wv2_ref[...], preferred_element_type=f32) + vb2_ref[...])


# ----------------------------------------------------------------------------
# One-time preparation (hoisted out of the jitted per-call path)
# ----------------------------------------------------------------------------
def _normalized_adjacency_host(edge_index, num_nodes):
    """Dense GCN-normalized adjacency (in-degree convention), plain JAX."""
    src = edge_index[0].astype(jnp.int32)
    dst = edge_index[1].astype(jnp.int32)
    adj = jnp.zeros((num_nodes, num_nodes), jnp.float32)
    adj = adj.at[dst, src].add(1.0) + jnp.eye(num_nodes, dtype=jnp.float32)
    dis = lax.rsqrt(jnp.sum(adj, axis=1))
    return adj * dis[:, None] * dis[None, :]


def prepare_network(params, square_edge_index, num_squares):
    """Precompute the static board adjacency and all fused / re-laid-out /
    down-cast weights once, so the jitted forward does zero weight re-layout.
    NOTE: weights are stored in the `x @ W` convention; converting from a
    PyTorch state_dict requires transposing nn.Linear / MHA weights first."""
    f32 = jnp.float32
    sg, pg = params["square_gnn"], params["piece_gnn"]
    att = params["cross_attention"]
    ph, vh = params["policy_head"], params["value_head"]
    d = sg["w2"].shape[1]
    dh = d // NUM_HEADS
    hidden = ph["w1"].shape[1]
    num_actions = ph["w2"].shape[1]

    # Fused policy|value first layer, viewed as per-square (D, 2*hidden) blocks
    # of the flattened-board Linear; stored bf16 (dominant HBM/VMEM tenant).
    w1c = jnp.concatenate([ph["w1"], vh["w1"]], axis=1)             # (64*D, 2H)
    hw1 = w1c.reshape(num_squares, d, 2 * hidden).astype(jnp.bfloat16)
    hb1 = jnp.concatenate([ph["b1"], vh["b1"]], axis=1)             # (1, 2H)
    wp2 = jnp.concatenate([ph["w2"], jnp.zeros((hidden, num_actions), f32)],
                          axis=0)                                    # (2H, A)
    wv2 = jnp.concatenate([jnp.zeros((hidden, 1), f32), vh["w2"]], axis=0)

    return {
        "a_sq": _normalized_adjacency_host(square_edge_index, num_squares),
        "sq_gnn": sg, "pc_gnn": pg,
        "wq": att["wq"], "bq": att["bq"], "wk": att["wk"], "bk": att["bk"],
        "wv": att["wv"], "bv": att["bv"],
        "wo_h": att["wo"].reshape(NUM_HEADS, dh, d), "bo": att["bo"],
        "hw1": hw1, "hb1": hb1, "wp2": wp2, "pb2": ph["b2"],
        "wv2": wv2, "vb2": vh["b2"],
    }


# ----------------------------------------------------------------------------
# Jitted forward: tiny per-call index prep + ONE pallas_call
# ----------------------------------------------------------------------------
@jax.jit
def chess_network_forward(prepared, square_features, piece_features,
                          piece_edge_index, piece_to_square_map=None):
    f32 = jnp.float32
    num_squares = square_features.shape[0]
    num_pieces = piece_features.shape[0]
    sg, pg = prepared["sq_gnn"], prepared["pc_gnn"]
    d = sg["w2"].shape[1]
    num_actions = prepared["wp2"].shape[1]
    two_hidden = prepared["hb1"].shape[1]

    sqf = square_features.astype(f32)
    out_shapes = (jax.ShapeDtypeStruct((1, num_actions), f32),
                  jax.ShapeDtypeStruct((1, 1), f32))

    use_attention = (piece_to_square_map is not None) and (num_pieces > 0)

    if use_attention:
        pcf = piece_features.astype(f32)
        pc_src_col = piece_edge_index[0, :].reshape(-1, 1).astype(jnp.int32)
        pc_dst_row = piece_edge_index[1, :].reshape(1, -1).astype(jnp.int32)
        pc_dst_col = piece_edge_index[1, :].reshape(-1, 1).astype(jnp.int32)
        p2s = piece_to_square_map.reshape(-1).astype(jnp.int32)

        operands = (p2s,
                    prepared["a_sq"], sqf, pcf,
                    pc_src_col, pc_dst_row, pc_dst_col,
                    sg["w1"], sg["b1"], sg["w2"], sg["b2"],
                    pg["w1"], pg["b1"], pg["w2"], pg["b2"],
                    prepared["wq"], prepared["bq"], prepared["wk"],
                    prepared["bk"], prepared["wv"], prepared["bv"],
                    prepared["wo_h"], prepared["bo"],
                    prepared["hw1"], prepared["hb1"], prepared["wp2"],
                    prepared["pb2"], prepared["wv2"], prepared["vb2"])

        n_edges_pc = pc_dst_row.shape[1]
        flops = 2 * (num_squares * sqf.shape[1] * d
                     + 2 * num_squares * num_squares * d
                     + num_squares * d * d
                     + num_pieces * pcf.shape[1] * d
                     + 2 * num_pieces * num_pieces * d
                     + num_pieces * d * d
                     + num_pieces * n_edges_pc * num_pieces
                     + 4 * num_pieces * d * d
                     + 2 * num_pieces * num_squares * d
                     + num_pieces * d * two_hidden
                     + two_hidden * (num_actions + 1))
        transcendentals = num_pieces * num_squares * NUM_HEADS + 2 * num_pieces + 1
        bytes_accessed = (sum(int(a.size) * a.dtype.itemsize for a in operands)
                          + 4 * (num_actions + 1))

        policy, value = pl.pallas_call(
            functools.partial(_fused_forward_kernel, num_heads=NUM_HEADS),
            out_shape=out_shapes,
            in_specs=[_SMEM] + [_VMEM] * (len(operands) - 1),
            out_specs=(_VMEM, _VMEM),
            cost_estimate=pl.CostEstimate(flops=flops,
                                          transcendentals=transcendentals,
                                          bytes_accessed=bytes_accessed),
        )(*operands)
    else:
        policy, value = pl.pallas_call(
            _square_only_kernel,
            out_shape=out_shapes,
            in_specs=[_VMEM] * 12,
            out_specs=(_VMEM, _VMEM),
            scratch_shapes=[pltpu.VMEM((num_squares, d), f32)],
        )(prepared["a_sq"], sqf,
          sg["w1"], sg["b1"], sg["w2"], sg["b2"],
          prepared["hw1"], prepared["hb1"], prepared["wp2"], prepared["pb2"],
          prepared["wv2"], prepared["vb2"])

    return policy[0], value[0]                                 # squeeze(0)


# ----------------------------------------------------------------------------
# Parameter init (canonical shapes; fused forms are derived in prepare_network)
# ----------------------------------------------------------------------------
def init_params(key, *, sq_in, pc_in, d, head_hidden, num_actions, num_squares):
    ks = iter(jax.random.split(key, 24))

    def w(shape):
        return jax.random.normal(next(ks), shape, jnp.float32) * 0.05

    def b(n):
        return jnp.zeros((1, n), jnp.float32)

    def gnn(in_dim):
        return {"w1": w((in_dim, d)), "b1": b(d), "w2": w((d, d)), "b2": b(d)}

    attn = {"wq": w((d, d)), "bq": b(d), "wk": w((d, d)), "bk": b(d),
            "wv": w((d, d)), "bv": b(d), "wo": w((d, d)), "bo": b(d)}
    flat = num_squares * d
    policy = {"w1": w((flat, head_hidden)), "b1": b(head_hidden),
              "w2": w((head_hidden, num_actions)), "b2": b(num_actions)}
    value = {"w1": w((flat, head_hidden)), "b1": b(head_hidden),
             "w2": w((head_hidden, 1)), "b2": b(1)}
    return {"square_gnn": gnn(sq_in), "piece_gnn": gnn(pc_in),
            "cross_attention": attn, "policy_head": policy, "value_head": value}


# ----------------------------------------------------------------------------
# Pure-JAX reference (same math, exact softmax) for a correctness check
# ----------------------------------------------------------------------------
def _reference_forward(prepared, square_features, piece_features,
                       piece_edge_index, piece_to_square_map):
    f32 = jnp.float32
    sg, pg = prepared["sq_gnn"], prepared["pc_gnn"]

    def gcn2(x, a, p):
        h = jnp.maximum(a @ (x @ p["w1"]) + p["b1"], 0.0)
        return a @ (h @ p["w2"]) + p["b2"]

    sq_emb = gcn2(square_features.astype(f32), prepared["a_sq"], sg)
    n_p = piece_features.shape[0]
    a_pc = _normalized_adjacency_host(piece_edge_index, n_p)
    pc_emb = gcn2(piece_features.astype(f32), a_pc, pg)

    d = sq_emb.shape[1]
    dh = d // NUM_HEADS
    q = pc_emb @ prepared["wq"] + prepared["bq"]
    k = sq_emb @ prepared["wk"] + prepared["bk"]
    v = sq_emb @ prepared["wv"] + prepared["bv"]
    attended = prepared["bo"]
    for h in range(NUM_HEADS):
        sl = slice(h * dh, (h + 1) * dh)
        s = (q[:, sl] @ k[:, sl].T) / math.sqrt(dh)
        p = jax.nn.softmax(s, axis=-1)
        attended = attended + (p @ v[:, sl]) @ prepared["wo_h"][h]

    final = jnp.zeros_like(sq_emb).at[piece_to_square_map].add(attended)
    x = final.reshape(1, -1)
    w1c = prepared["hw1"].astype(f32).reshape(x.shape[1], -1)
    hdn = jnp.maximum(x @ w1c + prepared["hb1"], 0.0)
    policy = hdn @ prepared["wp2"] + prepared["pb2"]
    value = jnp.tanh(hdn @ prepared["wv2"] + prepared["vb2"])
    return policy[0], value[0]


# TODO(synk): `return_attention=True` (returning batched attention weights) is
# not exposed; only the default (policy_logits, value) return path is implemented.

if __name__ == "__main__":
    NUM_SQUARES = 64      # chess board
    NUM_PIECES = 8
    SQ_FEAT = 12
    PC_FEAT = 12
    D = 32                # embedding dim (divisible by NUM_HEADS=4)
    HEAD_HIDDEN = 64      # fused policy|value hidden = 128 (lane-dense)
    NUM_ACTIONS = 128     # lane-dense policy output

    root = jax.random.PRNGKey(0)
    k_sqf, k_pcf, k_sqe, k_pce, k_map, k_par = jax.random.split(root, 6)

    square_features = jax.random.normal(k_sqf, (NUM_SQUARES, SQ_FEAT), jnp.float32)
    piece_features = jax.random.normal(k_pcf, (NUM_PIECES, PC_FEAT), jnp.float32)
    square_edge_index = jax.random.randint(k_sqe, (2, 128), 0, NUM_SQUARES, jnp.int32)
    piece_edge_index = jax.random.randint(k_pce, (2, 16), 0, NUM_PIECES, jnp.int32)
    piece_to_square_map = jax.random.randint(k_map, (NUM_PIECES,), 0, NUM_SQUARES,
                                             jnp.int32)

    params = init_params(k_par, sq_in=SQ_FEAT, pc_in=PC_FEAT, d=D,
                         head_hidden=HEAD_HIDDEN, num_actions=NUM_ACTIONS,
                         num_squares=NUM_SQUARES)

    # One-time prep: static board adjacency + fused/bf16/re-laid-out weights.
    prepared = prepare_network(params, square_edge_index, NUM_SQUARES)

    policy_logits, value = chess_network_forward(
        prepared, square_features, piece_features, piece_edge_index,
        piece_to_square_map)
    policy_logits = jax.block_until_ready(policy_logits)
    value = jax.block_until_ready(value)

    assert policy_logits.shape == (NUM_ACTIONS,), policy_logits.shape
    assert value.shape == (1,), value.shape
    assert bool(jnp.all(jnp.isfinite(policy_logits))) and bool(jnp.isfinite(value[0]))
    assert -1.0 <= float(value[0]) <= 1.0

    ref_policy, ref_value = _reference_forward(
        prepared, square_features, piece_features, piece_edge_index,
        piece_to_square_map)
    assert jnp.allclose(policy_logits, ref_policy, rtol=2e-2, atol=2e-2), (
        float(jnp.max(jnp.abs(policy_logits - ref_policy))))
    assert jnp.allclose(value, ref_value, rtol=2e-2, atol=2e-2), (
        float(jnp.max(jnp.abs(value - ref_value))))

    print("KERNEL_OK")
</pallas_src>

<mosaic_0001>
module attributes {stable_mosaic.version = 11 : i64} {
  func.func @_fused_forward_kernel(%arg0: memref<8xi32, #tpu.memory_space<smem>>, %arg1: memref<64x64xf32, #tpu.memory_space<vmem>>, %arg2: memref<64x12xf32, #tpu.memory_space<vmem>>, %arg3: memref<8x12xf32, #tpu.memory_space<vmem>>, %arg4: memref<16x1xi32, #tpu.memory_space<vmem>>, %arg5: memref<1x16xi32, #tpu.memory_space<vmem>>, %arg6: memref<16x1xi32, #tpu.memory_space<vmem>>, %arg7: memref<12x32xf32, #tpu.memory_space<vmem>>, %arg8: memref<1x32xf32, #tpu.memory_space<vmem>>, %arg9: memref<32x32xf32, #tpu.memory_space<vmem>>, %arg10: memref<1x32xf32, #tpu.memory_space<vmem>>, %arg11: memref<12x32xf32, #tpu.memory_space<vmem>>, %arg12: memref<1x32xf32, #tpu.memory_space<vmem>>, %arg13: memref<32x32xf32, #tpu.memory_space<vmem>>, %arg14: memref<1x32xf32, #tpu.memory_space<vmem>>, %arg15: memref<32x32xf32, #tpu.memory_space<vmem>>, %arg16: memref<1x32xf32, #tpu.memory_space<vmem>>, %arg17: memref<32x32xf32, #tpu.memory_space<vmem>>, %arg18: memref<1x32xf32, #tpu.memory_space<vmem>>, %arg19: memref<32x32xf32, #tpu.memory_space<vmem>>, %arg20: memref<1x32xf32, #tpu.memory_space<vmem>>, %arg21: memref<4x8x32xf32, #tpu.memory_space<vmem>>, %arg22: memref<1x32xf32, #tpu.memory_space<vmem>>, %arg23: memref<64x32x128xbf16, #tpu.memory_space<vmem>>, %arg24: memref<1x128xf32, #tpu.memory_space<vmem>>, %arg25: memref<128x128xf32, #tpu.memory_space<vmem>>, %arg26: memref<1x128xf32, #tpu.memory_space<vmem>>, %arg27: memref<128x1xf32, #tpu.memory_space<vmem>>, %arg28: memref<1x1xf32, #tpu.memory_space<vmem>>, %arg29: memref<1x128xf32, #tpu.memory_space<vmem>>, %arg30: memref<1x1xf32, #tpu.memory_space<vmem>>) attributes {dimension_semantics = [], scalar_prefetch = 0 : i64, scratch_operands = 0 : i64, tpu.core_type = #tpu.core_type<tc>} {
    %c0 = arith.constant 0 : index
    %c0_0 = arith.constant 0 : index
    %0 = vector.load %arg2[%c0, %c0_0] : memref<64x12xf32, #tpu.memory_space<vmem>>, vector<64x12xf32>
    %c0_1 = arith.constant 0 : index
    %c0_2 = arith.constant 0 : index
    %1 = vector.load %arg1[%c0_1, %c0_2] : memref<64x64xf32, #tpu.memory_space<vmem>>, vector<64x64xf32>
    %c0_3 = arith.constant 0 : index
    %c0_4 = arith.constant 0 : index
    %2 = vector.load %arg7[%c0_3, %c0_4] : memref<12x32xf32, #tpu.memory_space<vmem>>, vector<12x32xf32>
    %c0_5 = arith.constant 0 : index
    %c0_6 = arith.constant 0 : index
    %3 = vector.load %arg8[%c0_5, %c0_6] : memref<1x32xf32, #tpu.memory_space<vmem>>, vector<1x32xf32>
    %c0_7 = arith.constant 0 : index
    %c0_8 = arith.constant 0 : index
    %4 = vector.load %arg9[%c0_7, %c0_8] : memref<32x32xf32, #tpu.memory_space<vmem>>, vector<32x32xf32>
    %c0_9 = arith.constant 0 : index
    %c0_10 = arith.constant 0 : index
    %5 = vector.load %arg10[%c0_9, %c0_10] : memref<1x32xf32, #tpu.memory_space<vmem>>, vector<1x32xf32>
    %cst = arith.constant dense<0.000000e+00> : vector<64x32xf32>
    %6 = tpu.matmul %0, %2, %cst {dimension_numbers = #tpu.dot_dimension_numbers<[1], [0], [0], [1], [0, 0, 1, 1], [], []>} : vector<64x12xf32>, vector<12x32xf32>, vector<64x32xf32> -> vector<64x32xf32>
    %cst_11 = arith.constant dense<0.000000e+00> : vector<64x32xf32>
    %7 = tpu.matmul %1, %6, %cst_11 {dimension_numbers = #tpu.dot_dimension_numbers<[1], [0], [0], [1], [0, 0, 1, 1], [], []>} : vector<64x64xf32>, vector<64x32xf32>, vector<64x32xf32> -> vector<64x32xf32>
    %8 = vector.broadcast %3 : vector<1x32xf32> to vector<64x32xf32>
    %9 = arith.addf %7, %8 : vector<64x32xf32>
    %cst_12 = arith.constant 0.000000e+00 : f32
    %10 = vector.broadcast %cst_12 : f32 to vector<64x32xf32>
    %11 = arith.maximumf %9, %10 : vector<64x32xf32>
    %cst_13 = arith.constant dense<0.000000e+00> : vector<64x32xf32>
    %12 = tpu.matmul %11, %4, %cst_13 {dimension_numbers = #tpu.dot_dimension_numbers<[1], [0], [0], [1], [0, 0, 1, 1], [], []>} : vector<64x32xf32>, vector<32x32xf32>, vector<64x32xf32> -> vector<64x32xf32>
    %cst_14 = arith.constant dense<0.000000e+00> : vector<64x32xf32>
    %13 = tpu.matmul %1, %12, %cst_14 {dimension_numbers = #tpu.dot_dimension_numbers<[1], [0], [0], [1], [0, 0, 1, 1], [], []>} : vector<64x64xf32>, vector<64x32xf32>, vector<64x32xf32> -> vector<64x32xf32>
    %14 = vector.broadcast %5 : vector<1x32xf32> to vector<64x32xf32>
    %15 = arith.addf %13, %14 : vector<64x32xf32>
    %c0_15 = arith.constant 0 : index
    %c0_16 = arith.constant 0 : index
    %16 = vector.load %arg4[%c0_15, %c0_16] : memref<16x1xi32, #tpu.memory_space<vmem>>, vector<16x1xi32>
    %c0_17 = arith.constant 0 : index
    %c0_18 = arith.constant 0 : index
    %17 = vector.load %arg5[%c0_17, %c0_18] : memref<1x16xi32, #tpu.memory_space<vmem>>, vector<1x16xi32>
    %c0_19 = arith.constant 0 : index
    %c0_20 = arith.constant 0 : index
    %18 = vector.load %arg6[%c0_19, %c0_20] : memref<16x1xi32, #tpu.memory_space<vmem>>, vector<16x1xi32>
    %19 = tpu.iota {dimensions = array<i32: 0>} : vector<8x16xi32>
    %20 = tpu.iota {dimensions = array<i32: 1>} : vector<16x8xi32>
    %21 = vector.broadcast %17 : vector<1x16xi32> to vector<8x16xi32>
    %22 = arith.cmpi eq, %19, %21 : vector<8x16xi32>
    %cst_21 = arith.constant 1.000000e+00 : f32
    %cst_22 = arith.constant 0.000000e+00 : f32
    %23 = vector.broadcast %cst_21 : f32 to vector<8x16xf32>
    %24 = vector.broadcast %cst_22 : f32 to vector<8x16xf32>
    %25 = arith.select %22, %23, %24 : vector<8x16xi1>, vector<8x16xf32>
    %26 = vector.broadcast %16 : vector<16x1xi32> to vector<16x8xi32>
    %27 = arith.cmpi eq, %20, %26 : vector<16x8xi32>
    %cst_23 = arith.constant 1.000000e+00 : f32
    %cst_24 = arith.constant 0.000000e+00 : f32
    %28 = vector.broadcast %cst_23 : f32 to vector<16x8xf32>
    %29 = vector.broadcast %cst_24 : f32 to vector<16x8xf32>
    %30 = arith.select %27, %28, %29 : vector<16x8xi1>, vector<16x8xf32>
    %31 = vector.broadcast %18 : vector<16x1xi32> to vector<16x8xi32>
    %32 = arith.cmpi eq, %20, %31 : vector<16x8xi32>
    %cst_25 = arith.constant 1.000000e+00 : f32
    %cst_26 = arith.constant 0.000000e+00 : f32
    %33 = vector.broadcast %cst_25 : f32 to vector<16x8xf32>
    %34 = vector.broadcast %cst_26 : f32 to vector<16x8xf32>
    %35 = arith.select %32, %33, %34 : vector<16x8xi1>, vector<16x8xf32>
    %36 = tpu.iota {dimensions = array<i32: 0>} : vector<8x8xi32>
    %37 = tpu.iota {dimensions = array<i32: 1>} : vector<8x8xi32>
    %38 = arith.cmpi eq, %36, %37 : vector<8x8xi32>
    %cst_27 = arith.constant 1.000000e+00 : f32
    %cst_28 = arith.constant 0.000000e+00 : f32
    %39 = vector.broadcast %cst_27 : f32 to vector<8x8xf32>
    %40 = vector.broadcast %cst_28 : f32 to vector<8x8xf32>
    %41 = arith.select %38, %39, %40 : vector<8x8xi1>, vector<8x8xf32>
    %cst_29 = arith.constant dense<0.000000e+00> : vector<8x8xf32>
    %42 = tpu.matmul %25, %30, %cst_29 {dimension_numbers = #tpu.dot_dimension_numbers<[1], [0], [0], [1], [0, 0, 1, 1], [], []>} : vector<8x16xf32>, vector<16x8xf32>, vector<8x8xf32> -> vector<8x8xf32>
    %43 = arith.addf %42, %41 : vector<8x8xf32>
    %cst_30 = arith.constant dense<0.000000e+00> : vector<8xf32>
    %44 = vector.multi_reduction <add>, %25, %cst_30 [1] : vector<8x16xf32> to vector<8xf32>
    %45 = vector.shape_cast %44 : vector<8xf32> to vector<8x1xf32>
    %cst_31 = arith.constant 1.000000e+00 : f32
    %46 = vector.broadcast %cst_31 : f32 to vector<8x1xf32>
    %47 = arith.addf %45, %46 : vector<8x1xf32>
    %cst_32 = arith.constant dense<0.000000e+00> : vector<8xf32>
    %48 = vector.multi_reduction <add>, %35, %cst_32 [0] : vector<16x8xf32> to vector<8xf32>
    %49 = vector.shape_cast %48 : vector<8xf32> to vector<1x8xf32>
    %cst_33 = arith.constant 1.000000e+00 : f32
    %50 = vector.broadcast %cst_33 : f32 to vector<1x8xf32>
    %51 = arith.addf %49, %50 : vector<1x8xf32>
    %52 = math.rsqrt %47 : vector<8x1xf32>
    %53 = vector.broadcast %52 : vector<8x1xf32> to vector<8x8xf32>
    %54 = arith.mulf %43, %53 : vector<8x8xf32>
    %55 = math.rsqrt %51 : vector<1x8xf32>
    %56 = vector.broadcast %55 : vector<1x8xf32> to vector<8x8xf32>
    %57 = arith.mulf %54, %56 : vector<8x8xf32>
    %c0_34 = arith.constant 0 : index
    %c0_35 = arith.constant 0 : index
    %58 = vector.load %arg3[%c0_34, %c0_35] : memref<8x12xf32, #tpu.memory_space<vmem>>, vector<8x12xf32>
    %c0_36 = arith.constant 0 : index
    %c0_37 = arith.constant 0 : index
    %59 = vector.load %arg11[%c0_36, %c0_37] : memref<12x32xf32, #tpu.memory_space<vmem>>, vector<12x32xf32>
    %c0_38 = arith.constant 0 : index
    %c0_39 = arith.constant 0 : index
    %60 = vector.load %arg12[%c0_38, %c0_39] : memref<1x32xf32, #tpu.memory_space<vmem>>, vector<1x32xf32>
    %c0_40 = arith.constant 0 : index
    %c0_41 = arith.constant 0 : index
    %61 = vector.load %arg13[%c0_40, %c0_41] : memref<32x32xf32, #tpu.memory_space<vmem>>, vector<32x32xf32>
    %c0_42 = arith.constant 0 : index
    %c0_43 = arith.constant 0 : index
    %62 = vector.load %arg14[%c0_42, %c0_43] : memref<1x32xf32, #tpu.memory_space<vmem>>, vector<1x32xf32>
    %cst_44 = arith.constant dense<0.000000e+00> : vector<8x32xf32>
    %63 = tpu.matmul %58, %59, %cst_44 {dimension_numbers = #tpu.dot_dimension_numbers<[1], [0], [0], [1], [0, 0, 1, 1], [], []>} : vector<8x12xf32>, vector<12x32xf32>, vector<8x32xf32> -> vector<8x32xf32>
    %cst_45 = arith.constant dense<0.000000e+00> : vector<8x32xf32>
    %64 = tpu.matmul %57, %63, %cst_45 {dimension_numbers = #tpu.dot_dimension_numbers<[1], [0], [0], [1], [0, 0, 1, 1], [], []>} : vector<8x8xf32>, vector<8x32xf32>, vector<8x32xf32> -> vector<8x32xf32>
    %65 = vector.broadcast %60 : vector<1x32xf32> to vector<8x32xf32>
    %66 = arith.addf %64, %65 : vector<8x32xf32>
    %cst_46 = arith.constant 0.000000e+00 : f32
    %67 = vector.broadcast %cst_46 : f32 to vector<8x32xf32>
    %68 = arith.maximumf %66, %67 : vector<8x32xf32>
    %cst_47 = arith.constant dense<0.000000e+00> : vector<8x32xf32>
    %69 = tpu.matmul %68, %61, %cst_47 {dimension_numbers = #tpu.dot_dimension_numbers<[1], [0], [0], [1], [0, 0, 1, 1], [], []>} : vector<8x32xf32>, vector<32x32xf32>, vector<8x32xf32> -> vector<8x32xf32>
    %cst_48 = arith.constant dense<0.000000e+00> : vector<8x32xf32>
    %70 = tpu.matmul %57, %69, %cst_48 {dimension_numbers = #tpu.dot_dimension_numbers<[1], [0], [0], [1], [0, 0, 1, 1], [], []>} : vector<8x8xf32>, vector<8x32xf32>, vector<8x32xf32> -> vector<8x32xf32>
    %71 = vector.broadcast %62 : vector<1x32xf32> to vector<8x32xf32>
    %72 = arith.addf %70, %71 : vector<8x32xf32>
    %c0_49 = arith.constant 0 : index
    %c0_50 = arith.constant 0 : index
    %73 = vector.load %arg15[%c0_49, %c0_50] : memref<32x32xf32, #tpu.memory_space<vmem>>, vector<32x32xf32>
    %cst_51 = arith.constant dense<0.000000e+00> : vector<8x32xf32>
    %74 = tpu.matmul %72, %73, %cst_51 {dimension_numbers = #tpu.dot_dimension_numbers<[1], [0], [0], [1], [0, 0, 1, 1], [], []>} : vector<8x32xf32>, vector<32x32xf32>, vector<8x32xf32> -> vector<8x32xf32>
    %c0_52 = arith.constant 0 : index
    %c0_53 = arith.constant 0 : index
    %75 = vector.load %arg16[%c0_52, %c0_53] : memref<1x32xf32, #tpu.memory_space<vmem>>, vector<1x32xf32>
    %76 = vector.broadcast %75 : vector<1x32xf32> to vector<8x32xf32>
    %77 = arith.addf %74, %76 : vector<8x32xf32>
    %c0_54 = arith.constant 0 : index
    %c0_55 = arith.constant 0 : index
    %78 = vector.load %arg17[%c0_54, %c0_55] : memref<32x32xf32, #tpu.memory_space<vmem>>, vector<32x32xf32>
    %cst_56 = arith.constant dense<0.000000e+00> : vector<64x32xf32>
    %79 = tpu.matmul %15, %78, %cst_56 {dimension_numbers = #tpu.dot_dimension_numbers<[1], [0], [0], [1], [0, 0, 1, 1], [], []>} : vector<64x32xf32>, vector<32x32xf32>, vector<64x32xf32> -> vector<64x32xf32>
    %c0_57 = arith.constant 0 : index
    %c0_58 = arith.constant 0 : index
    %80 = vector.load %arg18[%c0_57, %c0_58] : memref<1x32xf32, #tpu.memory_space<vmem>>, vector<1x32xf32>
    %81 = vector.broadcast %80 : vector<1x32xf32> to vector<64x32xf32>
    %82 = arith.addf %79, %81 : vector<64x32xf32>
    %c0_59 = arith.constant 0 : index
    %c0_60 = arith.constant 0 : index
    %83 = vector.load %arg19[%c0_59, %c0_60] : memref<32x32xf32, #tpu.memory_space<vmem>>, vector<32x32xf32>
    %cst_61 = arith.constant dense<0.000000e+00> : vector<64x32xf32>
    %84 = tpu.matmul %15, %83, %cst_61 {dimension_numbers = #tpu.dot_dimension_numbers<[1], [0], [0], [1], [0, 0, 1, 1], [], []>} : vector<64x32xf32>, vector<32x32xf32>, vector<64x32xf32> -> vector<64x32xf32>
    %c0_62 = arith.constant 0 : index
    %c0_63 = arith.constant 0 : index
    %85 = vector.load %arg20[%c0_62, %c0_63] : memref<1x32xf32, #tpu.memory_space<vmem>>, vector<1x32xf32>
    %86 = vector.broadcast %85 : vector<1x32xf32> to vector<64x32xf32>
    %87 = arith.addf %84, %86 : vector<64x32xf32>
    %c0_64 = arith.constant 0 : index
    %c0_65 = arith.constant 0 : index
    %88 = vector.load %arg22[%c0_64, %c0_65] : memref<1x32xf32, #tpu.memory_space<vmem>>, vector<1x32xf32>
    %89 = vector.extract_strided_slice %77 {offsets = [0, 0], sizes = [8, 8], strides = [1, 1]} : vector<8x32xf32> to vector<8x8xf32>
    %90 = vector.extract_strided_slice %82 {offsets = [0, 0], sizes = [64, 8], strides = [1, 1]} : vector<64x32xf32> to vector<64x8xf32>
    %91 = vector.extract_strided_slice %87 {offsets = [0, 0], sizes = [64, 8], strides = [1, 1]} : vector<64x32xf32> to vector<64x8xf32>
    %cst_66 = arith.constant dense<0.000000e+00> : vector<8x64xf32>
    %92 = tpu.matmul %89, %90, %cst_66 {dimension_numbers = #tpu.dot_dimension_numbers<[1], [1], [0], [0], [0, 0, 1, 0], [], []>} : vector<8x8xf32>, vector<64x8xf32>, vector<8x64xf32> -> vector<8x64xf32>
    %cst_67 = arith.constant 0.353553385 : f32
    %93 = vector.broadcast %cst_67 : f32 to vector<8x64xf32>
    %94 = arith.mulf %92, %93 : vector<8x64xf32>
    %cst_68 = arith.constant dense<0xFF800000> : vector<8xf32>
    %95 = vector.multi_reduction <maximumf>, %94, %cst_68 [1] : vector<8x64xf32> to vector<8xf32>
    %96 = vector.shape_cast %95 : vector<8xf32> to vector<8x1xf32>
    %97 = vector.broadcast %96 : vector<8x1xf32> to vector<8x64xf32>
    %98 = arith.subf %94, %97 : vector<8x64xf32>
    %99 = math.exp %98 : vector<8x64xf32>
    %cst_69 = arith.constant dense<0.000000e+00> : vector<8xf32>
    %100 = vector.multi_reduction <add>, %99, %cst_69 [1] : vector<8x64xf32> to vector<8xf32>
    %101 = vector.shape_cast %100 : vector<8xf32> to vector<8x1xf32>
    %102 = tpu.reciprocal %101 {approx = true} : vector<8x1xf32> -> vector<8x1xf32>
    %103 = vector.broadcast %102 : vector<8x1xf32> to vector<8x64xf32>
    %104 = arith.mulf %99, %103 : vector<8x64xf32>
    %cst_70 = arith.constant dense<0.000000e+00> : vector<8x8xf32>
    %105 = tpu.matmul %104, %91, %cst_70 {dimension_numbers = #tpu.dot_dimension_numbers<[1], [0], [0], [1], [0, 0, 1, 1], [], []>} : vector<8x64xf32>, vector<64x8xf32>, vector<8x8xf32> -> vector<8x8xf32>
    %c0_71 = arith.constant 0 : index
    %c0_72 = arith.constant 0 : index
    %c0_73 = arith.constant 0 : index
    %106 = vector.load %arg21[%c0_71, %c0_72, %c0_73] : memref<4x8x32xf32, #tpu.memory_space<vmem>>, vector<1x8x32xf32>
    %107 = vector.shape_cast %106 : vector<1x8x32xf32> to vector<8x32xf32>
    %cst_74 = arith.constant dense<0.000000e+00> : vector<8x32xf32>
    %108 = tpu.matmul %105, %107, %cst_74 {dimension_numbers = #tpu.dot_dimension_numbers<[1], [0], [0], [1], [0, 0, 1, 1], [], []>} : vector<8x8xf32>, vector<8x32xf32>, vector<8x32xf32> -> vector<8x32xf32>
    %109 = vector.broadcast %88 : vector<1x32xf32> to vector<8x32xf32>
    %110 = arith.addf %109, %108 : vector<8x32xf32>
    %111 = vector.extract_strided_slice %77 {offsets = [0, 8], sizes = [8, 8], strides = [1, 1]} : vector<8x32xf32> to vector<8x8xf32>
    %112 = vector.extract_strided_slice %82 {offsets = [0, 8], sizes = [64, 8], strides = [1, 1]} : vector<64x32xf32> to vector<64x8xf32>
    %113 = vector.extract_strided_slice %87 {offsets = [0, 8], sizes = [64, 8], strides = [1, 1]} : vector<64x32xf32> to vector<64x8xf32>
    %cst_75 = arith.constant dense<0.000000e+00> : vector<8x64xf32>
    %114 = tpu.matmul %111, %112, %cst_75 {dimension_numbers = #tpu.dot_dimension_numbers<[1], [1], [0], [0], [0, 0, 1, 0], [], []>} : vector<8x8xf32>, vector<64x8xf32>, vector<8x64xf32> -> vector<8x64xf32>
    %cst_76 = arith.constant 0.353553385 : f32
    %115 = vector.broadcast %cst_76 : f32 to vector<8x64xf32>
    %116 = arith.mulf %114, %115 : vector<8x64xf32>
    %cst_77 = arith.constant dense<0xFF800000> : vector<8xf32>
    %117 = vector.multi_reduction <maximumf>, %116, %cst_77 [1] : vector<8x64xf32> to vector<8xf32>
    %118 = vector.shape_cast %117 : vector<8xf32> to vector<8x1xf32>
    %119 = vector.broadcast %118 : vector<8x1xf32> to vector<8x64xf32>
    %120 = arith.subf %116, %119 : vector<8x64xf32>
    %121 = math.exp %120 : vector<8x64xf32>
    %cst_78 = arith.constant dense<0.000000e+00> : vector<8xf32>
    %122 = vector.multi_reduction <add>, %121, %cst_78 [1] : vector<8x64xf32> to vector<8xf32>
    %123 = vector.shape_cast %122 : vector<8xf32> to vector<8x1xf32>
    %124 = tpu.reciprocal %123 {approx = true} : vector<8x1xf32> -> vector<8x1xf32>
    %125 = vector.broadcast %124 : vector<8x1xf32> to vector<8x64xf32>
    %126 = arith.mulf %121, %125 : vector<8x64xf32>
    %cst_79 = arith.constant dense<0.000000e+00> : vector<8x8xf32>
    %127 = tpu.matmul %126, %113, %cst_79 {dimension_numbers = #tpu.dot_dimension_numbers<[1], [0], [0], [1], [0, 0, 1, 1], [], []>} : vector<8x64xf32>, vector<64x8xf32>, vector<8x8xf32> -> vector<8x8xf32>
    %c1 = arith.constant 1 : index
    %c0_80 = arith.constant 0 : index
    %c0_81 = arith.constant 0 : index
    %128 = vector.load %arg21[%c1, %c0_80, %c0_81] : memref<4x8x32xf32, #tpu.memory_space<vmem>>, vector<1x8x32xf32>
    %129 = vector.shape_cast %128 : vector<1x8x32xf32> to vector<8x32xf32>
    %cst_82 = arith.constant dense<0.000000e+00> : vector<8x32xf32>
    %130 = tpu.matmul %127, %129, %cst_82 {dimension_numbers = #tpu.dot_dimension_numbers<[1], [0], [0], [1], [0, 0, 1, 1], [], []>} : vector<8x8xf32>, vector<8x32xf32>, vector<8x32xf32> -> vector<8x32xf32>
    %131 = arith.addf %110, %130 : vector<8x32xf32>
    %132 = vector.extract_strided_slice %77 {offsets = [0, 16], sizes = [8, 8], strides = [1, 1]} : vector<8x32xf32> to vector<8x8xf32>
    %133 = vector.extract_strided_slice %82 {offsets = [0, 16], sizes = [64, 8], strides = [1, 1]} : vector<64x32xf32> to vector<64x8xf32>
    %134 = vector.extract_strided_slice %87 {offsets = [0, 16], sizes = [64, 8], strides = [1, 1]} : vector<64x32xf32> to vector<64x8xf32>
    %cst_83 = arith.constant dense<0.000000e+00> : vector<8x64xf32>
    %135 = tpu.matmul %132, %133, %cst_83 {dimension_numbers = #tpu.dot_dimension_numbers<[1], [1], [0], [0], [0, 0, 1, 0], [], []>} : vector<8x8xf32>, vector<64x8xf32>, vector<8x64xf32> -> vector<8x64xf32>
    %cst_84 = arith.constant 0.353553385 : f32
    %136 = vector.broadcast %cst_84 : f32 to vector<8x64xf32>
    %137 = arith.mulf %135, %136 : vector<8x64xf32>
    %cst_85 = arith.constant dense<0xFF800000> : vector<8xf32>
    %138 = vector.multi_reduction <maximumf>, %137, %cst_85 [1] : vector<8x64xf32> to vector<8xf32>
    %139 = vector.shape_cast %138 : vector<8xf32> to vector<8x1xf32>
    %140 = vector.broadcast %139 : vector<8x1xf32> to vector<8x64xf32>
    %141 = arith.subf %137, %140 : vector<8x64xf32>
    %142 = math.exp %141 : vector<8x64xf32>
    %cst_86 = arith.constant dense<0.000000e+00> : vector<8xf32>
    %143 = vector.multi_reduction <add>, %142, %cst_86 [1] : vector<8x64xf32> to vector<8xf32>
    %144 = vector.shape_cast %143 : vector<8xf32> to vector<8x1xf32>
    %145 = tpu.reciprocal %144 {approx = true} : vector<8x1xf32> -> vector<8x1xf32>
    %146 = vector.broadcast %145 : vector<8x1xf32> to vector<8x64xf32>
    %147 = arith.mulf %142, %146 : vector<8x64xf32>
    %cst_87 = arith.constant dense<0.000000e+00> : vector<8x8xf32>
    %148 = tpu.matmul %147, %134, %cst_87 {dimension_numbers = #tpu.dot_dimension_numbers<[1], [0], [0], [1], [0, 0, 1, 1], [], []>} : vector<8x64xf32>, vector<64x8xf32>, vector<8x8xf32> -> vector<8x8xf32>
    %c2 = arith.constant 2 : index
    %c0_88 = arith.constant 0 : index
    %c0_89 = arith.constant 0 : index
    %149 = vector.load %arg21[%c2, %c0_88, %c0_89] : memref<4x8x32xf32, #tpu.memory_space<vmem>>, vector<1x8x32xf32>
    %150 = vector.shape_cast %149 : vector<1x8x32xf32> to vector<8x32xf32>
    %cst_90 = arith.constant dense<0.000000e+00> : vector<8x32xf32>
    %151 = tpu.matmul %148, %150, %cst_90 {dimension_numbers = #tpu.dot_dimension_numbers<[1], [0], [0], [1], [0, 0, 1, 1], [], []>} : vector<8x8xf32>, vector<8x32xf32>, vector<8x32xf32> -> vector<8x32xf32>
    %152 = arith.addf %131, %151 : vector<8x32xf32>
    %153 = vector.extract_strided_slice %77 {offsets = [0, 24], sizes = [8, 8], strides = [1, 1]} : vector<8x32xf32> to vector<8x8xf32>
    %154 = vector.extract_strided_slice %82 {offsets = [0, 24], sizes = [64, 8], strides = [1, 1]} : vector<64x32xf32> to vector<64x8xf32>
    %155 = vector.extract_strided_slice %87 {offsets = [0, 24], sizes = [64, 8], strides = [1, 1]} : vector<64x32xf32> to vector<64x8xf32>
    %cst_91 = arith.constant dense<0.000000e+00> : vector<8x64xf32>
    %156 = tpu.matmul %153, %154, %cst_91 {dimension_numbers = #tpu.dot_dimension_numbers<[1], [1], [0], [0], [0, 0, 1, 0], [], []>} : vector<8x8xf32>, vector<64x8xf32>, vector<8x64xf32> -> vector<8x64xf32>
    %cst_92 = arith.constant 0.353553385 : f32
    %157 = vector.broadcast %cst_92 : f32 to vector<8x64xf32>
    %158 = arith.mulf %156, %157 : vector<8x64xf32>
    %cst_93 = arith.constant dense<0xFF800000> : vector<8xf32>
    %159 = vector.multi_reduction <maximumf>, %158, %cst_93 [1] : vector<8x64xf32> to vector<8xf32>
    %160 = vector.shape_cast %159 : vector<8xf32> to vector<8x1xf32>
    %161 = vector.broadcast %160 : vector<8x1xf32> to vector<8x64xf32>
    %162 = arith.subf %158, %161 : vector<8x64xf32>
    %163 = math.exp %162 : vector<8x64xf32>
    %cst_94 = arith.constant dense<0.000000e+00> : vector<8xf32>
    %164 = vector.multi_reduction <add>, %163, %cst_94 [1] : vector<8x64xf32> to vector<8xf32>
    %165 = vector.shape_cast %164 : vector<8xf32> to vector<8x1xf32>
    %166 = tpu.reciprocal %165 {approx = true} : vector<8x1xf32> -> vector<8x1xf32>
    %167 = vector.broadcast %166 : vector<8x1xf32> to vector<8x64xf32>
    %168 = arith.mulf %163, %167 : vector<8x64xf32>
    %cst_95 = arith.constant dense<0.000000e+00> : vector<8x8xf32>
    %169 = tpu.matmul %168, %155, %cst_95 {dimension_numbers = #tpu.dot_dimension_numbers<[1], [0], [0], [1], [0, 0, 1, 1], [], []>} : vector<8x64xf32>, vector<64x8xf32>, vector<8x8xf32> -> vector<8x8xf32>
    %c3 = arith.constant 3 : index
    %c0_96 = arith.constant 0 : index
    %c0_97 = arith.constant 0 : index
    %170 = vector.load %arg21[%c3, %c0_96, %c0_97] : memref<4x8x32xf32, #tpu.memory_space<vmem>>, vector<1x8x32xf32>
    %171 = vector.shape_cast %170 : vector<1x8x32xf32> to vector<8x32xf32>
    %cst_98 = arith.constant dense<0.000000e+00> : vector<8x32xf32>
    %172 = tpu.matmul %169, %171, %cst_98 {dimension_numbers = #tpu.dot_dimension_numbers<[1], [0], [0], [1], [0, 0, 1, 1], [], []>} : vector<8x8xf32>, vector<8x32xf32>, vector<8x32xf32> -> vector<8x32xf32>
    %173 = arith.addf %152, %172 : vector<8x32xf32>
    %c0_99 = arith.constant 0 : index
    %c0_100 = arith.constant 0 : index
    %174 = vector.load %arg24[%c0_99, %c0_100] : memref<1x128xf32, #tpu.memory_space<vmem>>, vector<1x128xf32>
    %c0_101 = arith.constant 0 : index
    %175 = memref.load %arg0[%c0_101] : memref<8xi32, #tpu.memory_space<smem>>
    %176 = arith.index_cast %175 : i32 to index
    %c0_102 = arith.constant 0 : index
    %c0_103 = arith.constant 0 : index
    %177 = vector.load %arg23[%176, %c0_102, %c0_103] : memref<64x32x128xbf16, #tpu.memory_space<vmem>>, vector<1x32x128xbf16>
    %178 = vector.shape_cast %177 : vector<1x32x128xbf16> to vector<32x128xbf16>
    %179 = arith.extf %178 : vector<32x128xbf16> to vector<32x128xf32>
    %180 = vector.extract_strided_slice %173 {offsets = [0, 0], sizes = [1, 32], strides = [1, 1]} : vector<8x32xf32> to vector<1x32xf32>
    %cst_104 = arith.constant dense<0.000000e+00> : vector<1x128xf32>
    %181 = tpu.matmul %180, %179, %cst_104 {dimension_numbers = #tpu.dot_dimension_numbers<[1], [0], [0], [1], [0, 0, 1, 1], [], []>} : vector<1x32xf32>, vector<32x128xf32>, vector<1x128xf32> -> vector<1x128xf32>
    %182 = arith.addf %174, %181 : vector<1x128xf32>
    %c1_105 = arith.constant 1 : index
    %183 = memref.load %arg0[%c1_105] : memref<8xi32, #tpu.memory_space<smem>>
    %184 = arith.index_cast %183 : i32 to index
    %c0_106 = arith.constant 0 : index
    %c0_107 = arith.constant 0 : index
    %185 = vector.load %arg23[%184, %c0_106, %c0_107] : memref<64x32x128xbf16, #tpu.memory_space<vmem>>, vector<1x32x128xbf16>
    %186 = vector.shape_cast %185 : vector<1x32x128xbf16> to vector<32x128xbf16>
    %187 = arith.extf %186 : vector<32x128xbf16> to vector<32x128xf32>
    %188 = vector.extract_strided_slice %173 {offsets = [1, 0], sizes = [1, 32], strides = [1, 1]} : vector<8x32xf32> to vector<1x32xf32>
    %cst_108 = arith.constant dense<0.000000e+00> : vector<1x128xf32>
    %189 = tpu.matmul %188, %187, %cst_108 {dimension_numbers = #tpu.dot_dimension_numbers<[1], [0], [0], [1], [0, 0, 1, 1], [], []>} : vector<1x32xf32>, vector<32x128xf32>, vector<1x128xf32> -> vector<1x128xf32>
    %190 = arith.addf %182, %189 : vector<1x128xf32>
    %c2_109 = arith.constant 2 : index
    %191 = memref.load %arg0[%c2_109] : memref<8xi32, #tpu.memory_space<smem>>
    %192 = arith.index_cast %191 : i32 to index
    %c0_110 = arith.constant 0 : index
    %c0_111 = arith.constant 0 : index
    %193 = vector.load %arg23[%192, %c0_110, %c0_111] : memref<64x32x128xbf16, #tpu.memory_space<vmem>>, vector<1x32x128xbf16>
    %194 = vector.shape_cast %193 : vector<1x32x128xbf16> to vector<32x128xbf16>
    %195 = arith.extf %194 : vector<32x128xbf16> to vector<32x128xf32>
    %196 = vector.extract_strided_slice %173 {offsets = [2, 0], sizes = [1, 32], strides = [1, 1]} : vector<8x32xf32> to vector<1x32xf32>
    %cst_112 = arith.constant dense<0.000000e+00> : vector<1x128xf32>
    %197 = tpu.matmul %196, %195, %cst_112 {dimension_numbers = #tpu.dot_dimension_numbers<[1], [0], [0], [1], [0, 0, 1, 1], [], []>} : vector<1x32xf32>, vector<32x128xf32>, vector<1x128xf32> -> vector<1x128xf32>
    %198 = arith.addf %190, %197 : vector<1x128xf32>
    %c3_113 = arith.constant 3 : index
    %199 = memref.load %arg0[%c3_113] : memref<8xi32, #tpu.memory_space<smem>>
    %200 = arith.index_cast %199 : i32 to index
    %c0_114 = arith.constant 0 : index
    %c0_115 = arith.constant 0 : index
    %201 = vector.load %arg23[%200, %c0_114, %c0_115] : memref<64x32x128xbf16, #tpu.memory_space<vmem>>, vector<1x32x128xbf16>
    %202 = vector.shape_cast %201 : vector<1x32x128xbf16> to vector<32x128xbf16>
    %203 = arith.extf %202 : vector<32x128xbf16> to vector<32x128xf32>
    %204 = vector.extract_strided_slice %173 {offsets = [3, 0], sizes = [1, 32], strides = [1, 1]} : vector<8x32xf32> to vector<1x32xf32>
    %cst_116 = arith.constant dense<0.000000e+00> : vector<1x128xf32>
    %205 = tpu.matmul %204, %203, %cst_116 {dimension_numbers = #tpu.dot_dimension_numbers<[1], [0], [0], [1], [0, 0, 1, 1], [], []>} : vector<1x32xf32>, vector<32x128xf32>, vector<1x128xf32> -> vector<1x128xf32>
    %206 = arith.addf %198, %205 : vector<1x128xf32>
    %c4 = arith.constant 4 : index
    %207 = memref.load %arg0[%c4] : memref<8xi32, #tpu.memory_space<smem>>
    %208 = arith.index_cast %207 : i32 to index
    %c0_117 = arith.constant 0 : index
    %c0_118 = arith.constant 0 : index
    %209 = vector.load %arg23[%208, %c0_117, %c0_118] : memref<64x32x128xbf16, #tpu.memory_space<vmem>>, vector<1x32x128xbf16>
    %210 = vector.shape_cast %209 : vector<1x32x128xbf16> to vector<32x128xbf16>
    %211 = arith.extf %210 : vector<32x128xbf16> to vector<32x128xf32>
    %212 = vector.extract_strided_slice %173 {offsets = [4, 0], sizes = [1, 32], strides = [1, 1]} : vector<8x32xf32> to vector<1x32xf32>
    %cst_119 = arith.constant dense<0.000000e+00> : vector<1x128xf32>
    %213 = tpu.matmul %212, %211, %cst_119 {dimension_numbers = #tpu.dot_dimension_numbers<[1], [0], [0], [1], [0, 0, 1, 1], [], []>} : vector<1x32xf32>, vector<32x128xf32>, vector<1x128xf32> -> vector<1x128xf32>
    %214 = arith.addf %206, %213 : vector<1x128xf32>
    %c5 = arith.constant 5 : index
    %215 = memref.load %arg0[%c5] : memref<8xi32, #tpu.memory_space<smem>>
    %216 = arith.index_cast %215 : i32 to index
    %c0_120 = arith.constant 0 : index
    %c0_121 = arith.constant 0 : index
    %217 = vector.load %arg23[%216, %c0_120, %c0_121] : memref<64x32x128xbf16, #tpu.memory_space<vmem>>, vector<1x32x128xbf16>
    %218 = vector.shape_cast %217 : vector<1x32x128xbf16> to vector<32x128xbf16>
    %219 = arith.extf %218 : vector<32x128xbf16> to vector<32x128xf32>
    %220 = vector.extract_strided_slice %173 {offsets = [5, 0], sizes = [1, 32], strides = [1, 1]} : vector<8x32xf32> to vector<1x32xf32>
    %cst_122 = arith.constant dense<0.000000e+00> : vector<1x128xf32>
    %221 = tpu.matmul %220, %219, %cst_122 {dimension_numbers = #tpu.dot_dimension_numbers<[1], [0], [0], [1], [0, 0, 1, 1], [], []>} : vector<1x32xf32>, vector<32x128xf32>, vector<1x128xf32> -> vector<1x128xf32>
    %222 = arith.addf %214, %221 : vector<1x128xf32>
    %c6 = arith.constant 6 : index
    %223 = memref.load %arg0[%c6] : memref<8xi32, #tpu.memory_space<smem>>
    %224 = arith.index_cast %223 : i32 to index
    %c0_123 = arith.constant 0 : index
    %c0_124 = arith.constant 0 : index
    %225 = vector.load %arg23[%224, %c0_123, %c0_124] : memref<64x32x128xbf16, #tpu.memory_space<vmem>>, vector<1x32x128xbf16>
    %226 = vector.shape_cast %225 : vector<1x32x128xbf16> to vector<32x128xbf16>
    %227 = arith.extf %226 : vector<32x128xbf16> to vector<32x128xf32>
    %228 = vector.extract_strided_slice %173 {offsets = [6, 0], sizes = [1, 32], strides = [1, 1]} : vector<8x32xf32> to vector<1x32xf32>
    %cst_125 = arith.constant dense<0.000000e+00> : vector<1x128xf32>
    %229 = tpu.matmul %228, %227, %cst_125 {dimension_numbers = #tpu.dot_dimension_numbers<[1], [0], [0], [1], [0, 0, 1, 1], [], []>} : vector<1x32xf32>, vector<32x128xf32>, vector<1x128xf32> -> vector<1x128xf32>
    %230 = arith.addf %222, %229 : vector<1x128xf32>
    %c7 = arith.constant 7 : index
    %231 = memref.load %arg0[%c7] : memref<8xi32, #tpu.memory_space<smem>>
    %232 = arith.index_cast %231 : i32 to index
    %c0_126 = arith.constant 0 : index
    %c0_127 = arith.constant 0 : index
    %233 = vector.load %arg23[%232, %c0_126, %c0_127] : memref<64x32x128xbf16, #tpu.memory_space<vmem>>, vector<1x32x128xbf16>
    %234 = vector.shape_cast %233 : vector<1x32x128xbf16> to vector<32x128xbf16>
    %235 = arith.extf %234 : vector<32x128xbf16> to vector<32x128xf32>
    %236 = vector.extract_strided_slice %173 {offsets = [7, 0], sizes = [1, 32], strides = [1, 1]} : vector<8x32xf32> to vector<1x32xf32>
    %cst_128 = arith.constant dense<0.000000e+00> : vector<1x128xf32>
    %237 = tpu.matmul %236, %235, %cst_128 {dimension_numbers = #tpu.dot_dimension_numbers<[1], [0], [0], [1], [0, 0, 1, 1], [], []>} : vector<1x32xf32>, vector<32x128xf32>, vector<1x128xf32> -> vector<1x128xf32>
    %238 = arith.addf %230, %237 : vector<1x128xf32>
    %cst_129 = arith.constant 0.000000e+00 : f32
    %239 = vector.broadcast %cst_129 : f32 to vector<1x128xf32>
    %240 = arith.maximumf %238, %239 : vector<1x128xf32>
    %c0_130 = arith.constant 0 : index
    %c0_131 = arith.constant 0 : index
    %241 = vector.load %arg25[%c0_130, %c0_131] : memref<128x128xf32, #tpu.memory_space<vmem>>, vector<128x128xf32>
    %cst_132 = arith.constant dense<0.000000e+00> : vector<1x128xf32>
    %242 = tpu.matmul %240, %241, %cst_132 {dimension_numbers = #tpu.dot_dimension_numbers<[1], [0], [0], [1], [0, 0, 1, 1], [], []>} : vector<1x128xf32>, vector<128x128xf32>, vector<1x128xf32> -> vector<1x128xf32>
    %c0_133 = arith.constant 0 : index
    %c0_134 = arith.constant 0 : index
    %243 = vector.load %arg26[%c0_133, %c0_134] : memref<1x128xf32, #tpu.memory_space<vmem>>, vector<1x128xf32>
    %244 = arith.addf %242, %243 : vector<1x128xf32>
    %c0_135 = arith.constant 0 : index
    %c0_136 = arith.constant 0 : index
    %245 = vector.load %arg29[%c0_135, %c0_136] : memref<1x128xf32, #tpu.memory_space<vmem>>, vector<1x128xf32>
    tpu.vector_store %arg29[%c0_135, %c0_136], %244 {strides = array<i32>} : memref<1x128xf32, #tpu.memory_space<vmem>>, vector<1x128xf32>,
    %c0_137 = arith.constant 0 : index
    %c0_138 = arith.constant 0 : index
    %246 = vector.load %arg27[%c0_137, %c0_138] : memref<128x1xf32, #tpu.memory_space<vmem>>, vector<128x1xf32>
    %cst_139 = arith.constant dense<0.000000e+00> : vector<1x1xf32>
    %247 = tpu.matmul %240, %246, %cst_139 {dimension_numbers = #tpu.dot_dimension_numbers<[1], [0], [0], [1], [0, 0, 1, 1], [], []>} : vector<1x128xf32>, vector<128x1xf32>, vector<1x1xf32> -> vector<1x1xf32>
    %c0_140 = arith.constant 0 : index
    %c0_141 = arith.constant 0 : index
    %248 = vector.load %arg28[%c0_140, %c0_141] : memref<1x1xf32, #tpu.memory_space<vmem>>, vector<1x1xf32>
    %249 = arith.addf %247, %248 : vector<1x1xf32>
    %250 = math.tanh %249 : vector<1x1xf32>
    %c0_142 = arith.constant 0 : index
    %c0_143 = arith.constant 0 : index
    %251 = vector.load %arg30[%c0_142, %c0_143] : memref<1x1xf32, #tpu.memory_space<vmem>>, vector<1x1xf32>
    tpu.vector_store %arg30[%c0_142, %c0_143], %250 {strides = array<i32>} : memref<1x1xf32, #tpu.memory_space<vmem>>, vector<1x1xf32>,
    return
  }
}

</mosaic_0001>

<bundles_post_ra>
// kernel: chess_network_forward.1
= control target key start
LH: loop header
LB: loop body
LE: loop exit
PB: predicated region body
PF: predicated region fallthrough
CT: control target
= control target key end

     0   :  { %s5241_s6 = smov 1   ;;  %s5242_s10 = smov 2   ;;  %s6144_s0 = inlined_call_operand.smem [shape: u32[31], index: -1, kind: input, shape index: {}] }
   0x1   :  { %s5309_s5 = sld [smem:[%s6144_s0]]   ;;  %s5243_s14 = smov 3  }
   0x2   :  { %s5314_s9 = sld [smem:[%s6144_s0 + %s5241_s6]]   ;;  %s5244_s18 = smov 4  }
   0x3   :  { %s5319_s13 = sld [smem:[%s6144_s0 + %s5242_s10]]   ;;  %s5245_s22 = smov 5  }
   0x4   :  { %s5324_s17 = sld [smem:[%s6144_s0 + %s5243_s14]]   ;;  %s5246_s26 = smov 6  }
   0x5   :  { %s5329_s21 = sld [smem:[%s6144_s0 + %s5244_s18]]   ;;  %s5247_s30 = smov 7  }
   0x6   :  { %s5334_s25 = sld [smem:[%s6144_s0 + %s5245_s22]]   ;;  %s5248_s4 = smov 8  }
   0x7   :  { %s5339_s29 = sld [smem:[%s6144_s0 + %s5246_s26]]   ;;  %s5249_s10 = smov 9  }
   0x8   :  { %6153 = sst [smem:[#allocation46_spill]] %s5314_s9  ;;  %s5250_s15 = smov 10  }
   0x9   :  { %6154 = sst [smem:[#allocation47_spill]] %s5319_s13  ;;  %s5251_s20 = smov 11  }
   0xa   :  { %6155 = sst [smem:[#allocation48_spill]] %s5324_s17  ;;  %s5252_s26 = smov 12  }
   0xb   :  { %6156 = sst [smem:[#allocation49_spill]] %s5329_s21  ;;  %s5253_s1 = smov 13  }
   0xc   :  { %6157 = sst [smem:[#allocation50_spill]] %s5334_s25  ;;  %s5254_s7 = smov 14  }
   0xd   :  { %6158 = sst [smem:[#allocation51_spill]] %s5339_s29  ;;  %s5256_s22 = smov 16  }
   0xe   :  { %s5344_s3 = sld [smem:[%s6144_s0 + %s5247_s30]]   ;;  %s5257_s28 = smov 17  }
   0xf   :  { %s5349_s8 = sld [smem:[%s6144_s0 + %s5248_s4]]  }
  0x10   :  { %s5354_s14 = sld [smem:[%s6144_s0 + %s5249_s10]]   ;;  %s5270_s10 = smov 30  }
  0x11   :  { %s5359_s19 = sld [smem:[%s6144_s0 + %s5250_s15]]   ;;  %s5255_s15 = smov 15  }
  0x12   :  { %s5364_s24 = sld [smem:[%s6144_s0 + %s5251_s20]]  }
  0x13   :  { %s5369_s30 = sld [smem:[%s6144_s0 + %s5252_s26]]  }
  0x14   :  { %s5374_s6 = sld [smem:[%s6144_s0 + %s5253_s1]]   ;;  %s5269_s1 = smov 29  }
  0x15   :  { %s5379_s12 = sld [smem:[%s6144_s0 + %s5254_s7]]   ;;  %s5258_s7 = smov 18  }
  0x16   :  { %6159 = sst [smem:[#allocation52_spill]] %s5354_s14 }
  0x17   :  { %s5384_s20 = sld [smem:[%s6144_s0 + %s5255_s15]]   ;;  %s5259_s15 = smov 19  }
  0x18   :  { %s5389_s27 = sld [smem:[%s6144_s0 + %s5256_s22]]   ;;  %s5260_s22 = smov 20  }
  0x19   :  { %s5394_s4 = sld [smem:[%s6144_s0 + %s5257_s28]]   ;;  %s5261_s28 = smov 21  }
  0x1a   :  { %6160 = sst [smem:[#allocation53_spill]] %s5374_s6 }
  0x1b   :  { %s5399_s6 = sld [smem:[%s6144_s0 + %s5258_s7]]   ;;  %s5262_s7 = smov 22  }
  0x1c   :  { %s5409_s17 = sld [smem:[%s6144_s0 + %s5260_s22]]   ;;  %s5264_s22 = smov 24  }
  0x1d   :  { %6161 = sst [smem:[#allocation54_spill]] %s5384_s20 }
  0x1e   :  { %s5404_s20 = sld [smem:[%s6144_s0 + %s5259_s15]]   ;;  %s5263_s15 = smov 23  }
  0x1f   :  { %s5414_s29 = sld [smem:[%s6144_s0 + %s5261_s28]]   ;;  %s5265_s28 = smov 25  }
  0x20   :  { %s5419_s25 = sld [smem:[%s6144_s0 + %s5262_s7]]   ;;  %s5266_s7 = smov 26  }
  0x21   :  { %s5424_s21 = sld [smem:[%s6144_s0 + %s5263_s15]]   ;;  %s5267_s15 = smov 27  }
  0x22   :  { %s5429_s14 = sld [smem:[%s6144_s0 + %s5264_s22]]   ;;  %s5268_s22 = smov 28  }
  0x23   :  { %s5434_s9 = sld [smem:[%s6144_s0 + %s5265_s28]]  }
  0x24   :  { %s5439_s13 = sld [smem:[%s6144_s0 + %s5266_s7]]  }
  0x26   :  { %6162 = sst [smem:[#allocation55_spill]] %s5419_s25 }
  0x27   :  { %s5444_s25 = sld [smem:[%s6144_s0 + %s5267_s15]]  }
  0x28   :  { %6163 = sst [smem:[#allocation56_spill]] %s5429_s14 }
  0x29   :  { %6164 = sst [smem:[#allocation57_spill]] %s5434_s9 }
  0x2a   :  { %6165 = sst [smem:[#allocation58_spill]] %s5439_s13 }
  0x2b   :  { %s3760_s14 = sld [smem:[%s6144_s0 + %s5268_s22]]  }
  0x2c   :  { %s5452_s9 = sld [smem:[%s6144_s0 + %s5269_s1]]  }
  0x2d   :  { %s5457_s13 = sld [smem:[%s6144_s0 + %s5270_s10]]  }
  0x31   :  { %v67_v0 = vstv %s3760_s14 }
  0x32   :  { %68 = vst [vmem:[#allocation2] sm:$0x1] %v67_v0 }
  0x33   :  { %69 = vsyncpa [#allocation6], 0 }
  0x34   :  { %70 = vsyncpa [#allocation4], 0 }
  0x35   :  { %71 = vsyncpa [#allocation9], 0 }
  0x36   :  { %72 = vsyncpa [#allocation12], 0 }
  0x37   :  { %73 = vsyncpa [#allocation15], 0 }
  0x38   :  { %74 = vsyncpa [#allocation18], 0 }
  0x39   :  { %75 = vsyncpa [#allocation21], 0 }
  0x3a   :  { %76 = vsyncpa [#allocation24], 0 }
  0x3b   :  { %77 = vsyncpa [#allocation27], 0 }
  0x3c   :  { %78 = vsyncpa [#allocation30], 0 }
  0x3d   :  { %79 = vsyncpa [#allocation5], 0 }
  0x3e   :  { %80 = vsyncpa [#allocation33], 0  ;;  %s5271_s15 = smov [#allocation8]  }
  0x3f   :  { %s121_s16 = sshll.u32 %s5271_s15, 4  ;;  %s122_s16 = int_to_ptr.vmem [resolvable:$true] %s121_s16 }
  0x40   :  { %s4853_s18 = scalar_lea.vmem %s122_s16, 16  ;;  %s4857_s0 = scalar_lea.vmem %s122_s16, 32 }
  0x41   :  { %p4854_p0 = scmp.ne.s32.totalorder %s122_s16, %s4853_s18  ;;  %p4858_p1 = scmp.lt.s32.totalorder %s122_s16, %s122_s16 }
  0x42   :  { %p4859_p2 = scmp.lt.s32.totalorder %s4857_s0, %s4853_s18 }
  0x44   :  { %p4860_p3 = por %p4859_p2, %p4858_p1 }
  0x46   :  { %p4861_p4 = pnand %p4860_p3, %p4854_p0 }
  0x48   :  { %4864 = shalt.err (!%p4861_p4)
}
  0x49   :  { %124 = dma.hbm_to_vmem [thread:$0]  %s5349_s8, 16, %s122_s16, [#allocation9]  }
  0x4a   :  { %s5272_s14 = smov [#allocation11]   ;;  %s5273_s23 = smov [#allocation14]  }
  0x4b   :  { %s142_s22 = sshll.u32 %s5272_s14, 4  ;;  %s167_s26 = sshll.u32 %s5273_s23, 4  ;;  %s143_s22 = int_to_ptr.vmem [resolvable:$true] %s142_s22  ;;  %s168_s26 = int_to_ptr.vmem [resolvable:$true] %s167_s26 }
  0x4c   :  { %s4873_s1 = scalar_lea.vmem %s143_s22, 256  ;;  %p4878_p6 = scmp.lt.s32.totalorder %s143_s22, %s143_s22 }
  0x4d   :  { %p4874_p5 = scmp.ne.s32.totalorder %s143_s22, %s4873_s1  ;;  %p4879_p7 = scmp.lt.s32.totalorder %s4873_s1, %s4873_s1 }
  0x4f   :  { %p4880_p8 = por %p4879_p7, %p4878_p6 }
  0x51   :  { %p4881_p9 = pnand %p4880_p8, %p4874_p5 }
  0x53   :  { %4884 = shalt.err (!%p4881_p9)
}
  0x54   :  { %s5274_s28 = smov 128   ;;  %s5275_s2 = smov 8  }
  0x55   :  { %148 = dma.hbm_to_vmem [thread:$0]  %s5364_s24, 256, %s143_s22, [#allocation12], %s5274_s28, %s5274_s28, %s5275_s2  }
  0x56   :  { %s4893_s8 = scalar_lea.vmem %s168_s26, 16  ;;  %s4897_s10 = scalar_lea.vmem %s168_s26, 32 }
  0x57   :  { %p4894_p10 = scmp.ne.s32.totalorder %s168_s26, %s4893_s8  ;;  %p4898_p11 = scmp.lt.s32.totalorder %s168_s26, %s168_s26 }
  0x58   :  { %p4899_p12 = scmp.lt.s32.totalorder %s4897_s10, %s4893_s8 }
  0x5a   :  { %p4900_p13 = por %p4899_p12, %p4898_p11 }
  0x5c   :  { %p4901_p0 = pnand %p4900_p13, %p4894_p10 }
  0x5e   :  { %4904 = shalt.err (!%p4901_p0)
}
  0x5f   :  { %170 = dma.hbm_to_vmem [thread:$0]  %s5379_s12, 16, %s168_s26, [#allocation15]  }
  0x60   :  { %s5276_s7 = smov [#allocation17]   ;;  %s5277_s15 = smov [#allocation20]  }
  0x61   :  { %s188_s11 = sshll.u32 %s5276_s7, 4  ;;  %s210_s16 = sshll.u32 %s5277_s15, 4  ;;  %s189_s11 = int_to_ptr.vmem [resolvable:$true] %s188_s11  ;;  %s211_s16 = int_to_ptr.vmem [resolvable:$true] %s210_s16 }
  0x62   :  { %s4913_s18 = scalar_lea.vmem %s189_s11, 512  ;;  %p4918_p2 = scmp.lt.s32.totalorder %s189_s11, %s189_s11 }
  0x63   :  { %p4914_p1 = scmp.ne.s32.totalorder %s189_s11, %s4913_s18  ;;  %p4919_p3 = scmp.lt.s32.totalorder %s4913_s18, %s4913_s18 }
  0x65   :  { %p4920_p4 = por %p4919_p3, %p4918_p2 }
  0x67   :  { %p4921_p5 = pnand %p4920_p4, %p4914_p1 }
  0x69   :  { %4924 = shalt.err (!%p4921_p5)
}
  0x6a   :  { %194 = dma.hbm_to_vmem [thread:$0]  %s5394_s4, 512, %s189_s11, [#allocation18], %s5274_s28, %s5274_s28, %s5275_s2  }
  0x6b   :  { %s4933_s24 = scalar_lea.vmem %s211_s16, 512  ;;  %p4938_p7 = scmp.lt.s32.totalorder %s211_s16, %s211_s16 }
  0x6c   :  { %p4934_p6 = scmp.ne.s32.totalorder %s211_s16, %s4933_s24  ;;  %p4939_p8 = scmp.lt.s32.totalorder %s4933_s24, %s4933_s24 }
  0x6e   :  { %p4940_p9 = por %p4939_p8, %p4938_p7 }
  0x70   :  { %p4941_p10 = pnand %p4940_p9, %p4934_p6 }
  0x72   :  { %4944 = shalt.err (!%p4941_p10)
}
  0x73   :  { %216 = dma.hbm_to_vmem [thread:$0]  %s5404_s20, 512, %s211_s16, [#allocation21], %s5274_s28, %s5274_s28, %s5275_s2  }
  0x74   :  { %s5278_s12 = smov [#allocation23]   ;;  %s5279_s14 = smov [#allocation26]  }
  0x75   :  { %s232_s0 = sshll.u32 %s5278_s12, 4  ;;  %s254_s22 = sshll.u32 %s5279_s14, 4  ;;  %s233_s0 = int_to_ptr.vmem [resolvable:$true] %s232_s0  ;;  %s255_s22 = int_to_ptr.vmem [resolvable:$true] %s254_s22 }
  0x76   :  { %s4953_s23 = scalar_lea.vmem %s233_s0, 512  ;;  %p4958_p12 = scmp.lt.s32.totalorder %s233_s0, %s233_s0 }
  0x77   :  { %p4954_p11 = scmp.ne.s32.totalorder %s233_s0, %s4953_s23  ;;  %p4959_p13 = scmp.lt.s32.totalorder %s4953_s23, %s4953_s23 }
  0x79   :  { %p4960_p0 = por %p4959_p13, %p4958_p12 }
  0x7b   :  { %p4961_p1 = pnand %p4960_p0, %p4954_p11 }
  0x7d   :  { %4964 = shalt.err (!%p4961_p1)
}
  0x7e   :  { %238 = dma.hbm_to_vmem [thread:$0]  %s5414_s29, 512, %s233_s0, [#allocation24], %s5274_s28, %s5274_s28, %s5275_s2  }
  0x7f   :  { %s87_s20 = sshll.u32 %s5309_s5, 4  ;;  %s4973_s4 = scalar_lea.vmem %s255_s22, 16384  ;;  %s88_s20 = int_to_ptr.vmem [resolvable:$true] %s87_s20 }
  0x80   :  { %p4974_p2 = scmp.ne.s32.totalorder %s255_s22, %s4973_s4  ;;  %p4978_p3 = scmp.lt.s32.totalorder %s255_s22, %s255_s22 }
  0x81   :  { %p4979_p4 = scmp.lt.s32.totalorder %s4973_s4, %s4973_s4 }
  0x83   :  { %p4980_p5 = por %p4979_p4, %p4978_p3 }
  0x85   :  { %p4981_p6 = pnand %p4980_p5, %p4974_p2 }
  0x87   :  { %4984 = shalt.err (!%p4981_p6)
}
  0x88   :  { %s5280_s26 = smov 64   ;;  %s5281_s1 = smov 4  }
  0x89   :  { %260 = dma.hbm_to_vmem [thread:$0]  %s5424_s21, 16384, %s255_s22, [#allocation27], %s5280_s26, %s5280_s26, %s5281_s1  }
  0x8a   :  { %s4985_s8 = scalar_lea.vmem %s88_s20, 16  ;;  %p4990_p8 = scmp.lt.s32.totalorder %s88_s20, %s88_s20 }
  0x8b   :  { %p4986_p7 = scmp.ne.s32.totalorder %s88_s20, %s4985_s8  ;;  %p4991_p9 = scmp.lt.s32.totalorder %s4985_s8, %s4985_s8 }
  0x8d   :  { %p4992_p10 = por %p4991_p9, %p4990_p8 }
  0x8f   :  { %p4993_p11 = pnand %p4992_p10, %p4986_p7 }
  0x91   :  { %4996 = shalt.err (!%p4993_p11)
}
  0x92   :  { %s5282_s5 = smov [#allocation3]   ;;  %s5283_s29 = smov [#allocation7]  }
  0x93   :  { %90 = dma.vmem_to_smem %s88_s20, 16, %s5282_s5, [#allocation6]  }
  0x94   :  { %s108_s10 = sshll.u32 %s5283_s29, 4  ;;  %s5284_s7 = smov [#allocation10]   ;;  %s109_s10 = int_to_ptr.vmem [resolvable:$true] %s108_s10 }
  0x95   :  { %s133_s11 = sshll.u32 %s5284_s7, 4  ;;  %s5005_s15 = scalar_lea.vmem %s109_s10, 256  ;;  %s134_s11 = int_to_ptr.vmem [resolvable:$true] %s133_s11 }
  0x96   :  { %p5006_p12 = scmp.ne.s32.totalorder %s109_s10, %s5005_s15  ;;  %p5010_p13 = scmp.lt.s32.totalorder %s109_s10, %s109_s10 }
  0x97   :  { %p5011_p0 = scmp.lt.s32.totalorder %s5005_s15, %s5005_s15 }
  0x99   :  { %p5012_p1 = por %p5011_p0, %p5010_p13 }
  0x9b   :  { %p5013_p2 = pnand %p5012_p1, %p5006_p12 }
  0x9d   :  { %5016 = shalt.err (!%p5013_p2)
}
  0x9e   :  { %114 = dma.hbm_to_vmem [thread:$0]  %s5344_s3, 256, %s109_s10, [#allocation4], %s5274_s28, %s5274_s28, %s5275_s2  }
  0x9f   :  { %s5025_s21 = scalar_lea.vmem %s134_s11, 16  ;;  %s5029_s16 = scalar_lea.vmem %s134_s11, 32 }
  0xa0   :  { %p5026_p3 = scmp.ne.s32.totalorder %s134_s11, %s5025_s21  ;;  %p5030_p4 = scmp.lt.s32.totalorder %s134_s11, %s134_s11 }
  0xa1   :  { %p5031_p5 = scmp.lt.s32.totalorder %s5029_s16, %s5025_s21 }
  0xa3   :  { %p5032_p6 = por %p5031_p5, %p5030_p4 }
  0xa5   :  { %p5033_p7 = pnand %p5032_p6, %p5026_p3 }
  0xa7   :  { %5036 = shalt.err (!%p5033_p7)
}
  0xa8   :  { %136 = dma.hbm_to_vmem [thread:$0]  %s5359_s19, 16, %s134_s11, [#allocation9]  }
  0xa9   :  { %s5285_s18 = smov [#allocation13]   ;;  %s5286_s12 = smov [#allocation16]  }
  0xaa   :  { %s155_s24 = sshll.u32 %s5285_s18, 4  ;;  %s179_s0 = sshll.u32 %s5286_s12, 4  ;;  %s156_s24 = int_to_ptr.vmem [resolvable:$true] %s155_s24  ;;  %s180_s0 = int_to_ptr.vmem [resolvable:$true] %s179_s0 }
  0xab   :  { %s5045_s14 = scalar_lea.vmem %s156_s24, 16  ;;  %s5049_s22 = scalar_lea.vmem %s156_s24, 32 }
  0xac   :  { %p5046_p8 = scmp.ne.s32.totalorder %s156_s24, %s5045_s14  ;;  %p5050_p9 = scmp.lt.s32.totalorder %s156_s24, %s156_s24 }
  0xad   :  { %p5051_p10 = scmp.lt.s32.totalorder %s5049_s22, %s5045_s14 }
  0xaf   :  { %p5052_p11 = por %p5051_p10, %p5050_p9 }
  0xb1   :  { %p5053_p12 = pnand %p5052_p11, %p5046_p8 }
  0xb3   :  { %5056 = shalt.err (!%p5053_p12)
}
  0xb4   :  { %158 = dma.hbm_to_vmem [thread:$0]  %s5369_s30, 16, %s156_s24, [#allocation12]  }
  0xb5   :  { %s5065_s3 = scalar_lea.vmem %s180_s0, 16  ;;  %s5069_s28 = scalar_lea.vmem %s180_s0, 32 }
  0xb6   :  { %p5066_p13 = scmp.ne.s32.totalorder %s180_s0, %s5065_s3  ;;  %p5070_p0 = scmp.lt.s32.totalorder %s180_s0, %s180_s0 }
  0xb7   :  { %p5071_p1 = scmp.lt.s32.totalorder %s5069_s28, %s5065_s3 }
  0xb9   :  { %p5072_p2 = por %p5071_p1, %p5070_p0 }
  0xbb   :  { %p5073_p3 = pnand %p5072_p2, %p5066_p13 }
  0xbd   :  { %5076 = shalt.err (!%p5073_p3)
}
  0xbe   :  { %182 = dma.hbm_to_vmem [thread:$0]  %s5389_s27, 16, %s180_s0, [#allocation15]  }
  0xbf   :  { %s5287_s19 = smov [#allocation19]   ;;  %s5288_s23 = smov [#allocation22]  }
  0xc0   :  { %s201_s2 = sshll.u32 %s5287_s19, 4  ;;  %s223_s20 = sshll.u32 %s5288_s23, 4  ;;  %s202_s2 = int_to_ptr.vmem [resolvable:$true] %s201_s2  ;;  %s224_s20 = int_to_ptr.vmem [resolvable:$true] %s223_s20 }
  0xc1   :  { %s5085_s4 = scalar_lea.vmem %s202_s2, 16  ;;  %s5089_s26 = scalar_lea.vmem %s202_s2, 32 }
  0xc2   :  { %p5086_p4 = scmp.ne.s32.totalorder %s202_s2, %s5085_s4  ;;  %p5090_p5 = scmp.lt.s32.totalorder %s202_s2, %s202_s2 }
  0xc3   :  { %p5091_p6 = scmp.lt.s32.totalorder %s5089_s26, %s5085_s4 }
  0xc5   :  { %p5092_p7 = por %p5091_p6, %p5090_p5 }
  0xc7   :  { %p5093_p8 = pnand %p5092_p7, %p5086_p4 }
  0xc9   :  { %5096 = shalt.err (!%p5093_p8)
}
  0xca   :  { %204 = dma.hbm_to_vmem [thread:$0]  %s5399_s6, 16, %s202_s2, [#allocation18]  }
  0xcb   :  { %s5105_s30 = scalar_lea.vmem %s224_s20, 16  ;;  %s5109_s1 = scalar_lea.vmem %s224_s20, 32 }
  0xcc   :  { %p5106_p9 = scmp.ne.s32.totalorder %s224_s20, %s5105_s30  ;;  %p5110_p10 = scmp.lt.s32.totalorder %s224_s20, %s224_s20 }
  0xcd   :  { %p5111_p11 = scmp.lt.s32.totalorder %s5109_s1, %s5105_s30 }
  0xcf   :  { %p5112_p12 = por %p5111_p11, %p5110_p10 }
  0xd1   :  { %p5113_p13 = pnand %p5112_p12, %p5106_p9 }
  0xd3   :  { %5116 = shalt.err (!%p5113_p13)
}
  0xd4   :  { %226 = dma.hbm_to_vmem [thread:$0]  %s5409_s17, 16, %s224_s20, [#allocation21]  }
  0xd5   :  { %s5289_s27 = smov [#allocation25]   ;;  %s5290_s5 = smov [#allocation28]  }
  0xd6   :  { %s245_s8 = sshll.u32 %s5289_s27, 4  ;;  %s267_s29 = sshll.u32 %s5290_s5, 4  ;;  %s246_s8 = int_to_ptr.vmem [resolvable:$true] %s245_s8  ;;  %s268_s29 = int_to_ptr.vmem [resolvable:$true] %s267_s29 }
  0xd7   :  { %s5125_s10 = scalar_lea.vmem %s246_s8, 16  ;;  %s5129_s7 = scalar_lea.vmem %s246_s8, 32 }
  0xd8   :  { %p5126_p0 = scmp.ne.s32.totalorder %s246_s8, %s5125_s10  ;;  %p5130_p1 = scmp.lt.s32.totalorder %s246_s8, %s246_s8 }
  0xd9   :  { %p5131_p2 = scmp.lt.s32.totalorder %s5129_s7, %s5125_s10 }
  0xdb   :  { %p5132_p3 = por %p5131_p2, %p5130_p1 }
  0xdd   :  { %p5133_p4 = pnand %p5132_p3, %p5126_p0 }
  0xdf   :  { %5136 = shalt.err (!%p5133_p4)
}
  0xe0   :  { %s6166_s6 = sld [smem:[#allocation55_spill]]  ;;  %s5145_s11 = scalar_lea.vmem %s268_s29, 16 }
  0xe1   :  { %p5146_p5 = scmp.ne.s32.totalorder %s268_s29, %s5145_s11  ;;  %s5149_s15 = scalar_lea.vmem %s268_s29, 32 }
  0xe2   :  { %p5150_p6 = scmp.lt.s32.totalorder %s268_s29, %s268_s29  ;;  %p5151_p7 = scmp.lt.s32.totalorder %s5149_s15, %s5145_s11 }
  0xe4   :  { %p5152_p8 = por %p5151_p7, %p5150_p6 }
  0xe6   :  { %248 = dma.hbm_to_vmem [thread:$0]  %s6166_s6, 16, %s246_s8, [#allocation24]  }
  0xe7   :  { %p5153_p9 = pnand %p5152_p8, %p5146_p5 }
  0xe9   :  { %5156 = shalt.err (!%p5153_p9)
}
  0xea   :  { %s6167_s17 = sld [smem:[#allocation56_spill]]  ;;  %s5291_s21 = smov [#allocation29]  }
  0xeb   :  { %s279_s16 = sshll.u32 %s5291_s21, 4  ;;  %s280_s16 = int_to_ptr.vmem [resolvable:$true] %s279_s16 }
  0xec   :  { %s5165_s18 = scalar_lea.vmem %s280_s16, 16  ;;  %s5169_s24 = scalar_lea.vmem %s280_s16, 32 }
  0xed   :  { %p5166_p10 = scmp.ne.s32.totalorder %s280_s16, %s5165_s18  ;;  %p5170_p11 = scmp.lt.s32.totalorder %s280_s16, %s280_s16 }
  0xee   :  { %p5171_p12 = scmp.lt.s32.totalorder %s5169_s24, %s5165_s18 }
  0xf0   :  { %270 = dma.hbm_to_vmem [thread:$0]  %s6167_s17, 16, %s268_s29, [#allocation27]  }
  0xf1   :  { %p5172_p13 = por %p5171_p12, %p5170_p11 }
  0xf3   :  { %p5173_p0 = pnand %p5172_p13, %p5166_p10 }
  0xf5   :  { %5176 = shalt.err (!%p5173_p0)
}
  0xf6   :  { %s6168_s12 = sld [smem:[#allocation58_spill]] }
  0xfc   :  { %282 = dma.hbm_to_vmem [thread:$0]  %s6168_s12, 16, %s280_s16, [#allocation30]  }
  0xfd   :  { %5217 = dma.done.wait [#allocation6], 16  }
  0xfe   :  { %5218 = vsyncadd [#allocation6], 4294967280 }
  0xff   :  { %5219 = dma.done.wait [#allocation4], 256  }
 0x100   :  { %5220 = vsyncadd [#allocation4], 4294967040 }
 0x101   :  { %5221 = dma.done.wait [#allocation9], 32  }
 0x102   :  { %5222 = vsyncadd [#allocation9], 4294967264 }
 0x103   :  { %5223 = dma.done.wait [#allocation12], 272  }
 0x104   :  { %5224 = vsyncadd [#allocation12], 4294967024 }
 0x105   :  { %5225 = dma.done.wait [#allocation15], 32  }
 0x106   :  { %5226 = vsyncadd [#allocation15], 4294967264 }
 0x107   :  { %5227 = dma.done.wait [#allocation18], 528  }
 0x108   :  { %5228 = vsyncadd [#allocation18], 4294966768 }
 0x109   :  { %5229 = dma.done.wait [#allocation21], 528  }
 0x10a   :  { %5230 = vsyncadd [#allocation21], 4294966768 }
 0x10b   :  { %5231 = dma.done.wait [#allocation24], 528  }
 0x10c   :  { %5232 = vsyncadd [#allocation24], 4294966768 }
 0x10d   :  { %5233 = dma.done.wait [#allocation27], 16400  }
 0x10e   :  { %5234 = vsyncadd [#allocation27], 4294950896 }
 0x10f   :  { %5235 = dma.done.wait [#allocation30], 16  }
 0x110   :  { %5236 = vsyncadd [#allocation30], 4294967280 }
 0x111   :  { %338 = sfence }
 0x112   :  { %v356_v1 = vld [vmem:[#allocation7 + $0x8] sm:$0xf]  ;;  %s6169_s0 = sld [smem:[#allocation47_spill]]  ;;  %vm388_vm0 = vcmask 1043456   ;;  %v355_v2 = vld [vmem:[#allocation7] sm:$0xff]  ;;  %vm363_vm1 = vcmask 97280   ;;  %v887_v59 = vlaneseq }
 0x113   :  { %4237 = vmatprep.subr.msk.mxu1 %vm388_vm0, %v356_v1  ;;  %s6170_s14 = sld [smem:[#allocation46_spill]]  ;;  %vm503_vm2 = vcmask 523264   ;;  %v5292_v32 = vmov 0   ;;  %v3772_v34 = vld [vmem:[#allocation8] ss:$0 sm:$0xff]  ;;  %vm641_vm3 = vcmask 261120  }
 0x114   :  { %4238 = vmatpush3.msk.msra.mxu1 %vm388_vm0, %v356_v1  ;;  %s6171_s22 = sld [smem:[#allocation52_spill]]  ;;  %4821 = vset.pattern.permute.xlu0 %v5292_v32  ;;  %v5563_v60 = vshrl.u32 %v887_v59, 7  ;;  %v5293_v62 = vmov 0.0   ;;  %vm919_vm5 = vcmask 130048   ;;  %vm5295_vm7 = vmmov 0   ;;  %s5296_s4 = smov 120  }
 0x115   :  { %4239 = vmatprep.subr.mxu1 %v355_v2  ;;  %s6172_s3 = sld [smem:[#allocation49_spill]]  ;;  %4822 = vset.pattern.permute.xlu1 %v5292_v32  ;;  %vm997_vm11 = vcmask 64512   ;;  %s5297_s26 = smov 112  }
 0x116   :  { %4240 = vmatpush3.msra.mxu1 %v355_v2  ;;  %s6173_s28 = sld [smem:[#allocation50_spill]]  ;;  %s5298_s30 = smov 104  }
 0x117   :  { %s6174_s19 = sld [smem:[#allocation51_spill]] }
 0x118   :  { %v339_v3 = vld [vmem:[%s6169_s0] sm:$0xff]  ;;  %v340_v4 = vld [vmem:[%s6169_s0 + $0x8] sm:$0xff]  ;;  %v341_v5 = vld [vmem:[%s6169_s0 + $0x10] sm:$0xff]  ;;  %s6175_s2 = sld [smem:[#allocation48_spill]] }
 0x119   :  { %4241 = vmatprep.mubr.msk.f32.mxu1 %vm363_vm1, %v339_v3  ;;  %v342_v6 = vld [vmem:[%s6169_s0 + $0x18] sm:$0xff]  ;;  %v343_v7 = vld [vmem:[%s6169_s0 + $0x20] sm:$0xff]  ;;  %v344_v8 = vld [vmem:[%s6169_s0 + $0x28] sm:$0xff]  ;;  %s6176_s23 = sld [smem:[#allocation53_spill]] }
 0x11a   :  { %4242 = vmatmul.mubr.msk.f32.vlgmr.msra.gmra.mxu1 %vm363_vm1, %v340_v4  ;;  %v345_v9 = vld [vmem:[%s6169_s0 + $0x30] sm:$0xff]  ;;  %v346_v10 = vld [vmem:[%s6169_s0 + $0x38] sm:$0xff]  ;;  %v5510_v11 = vld [vmem:[%s6170_s14] sm:$0xff]  ;;  %s6177_s20 = sld [smem:[#allocation54_spill]] }
 0x11b   :  { %4244 = vmatprep.mubr.msk.f32.mxu1 %vm363_vm1, %v341_v5  ;;  %v5515_v20 = vld [vmem:[%s6170_s14 + $0x8] sm:$0xff]  ;;  %v349_v21 = vld [vmem:[%s6170_s14 + $0x10] sm:$0xff]  ;;  %v5522_v22 = vld [vmem:[%s6170_s14 + $0x18] sm:$0xff]  ;;  %s3877_s1 = sld [smem:[#allocation3 + $0x1]] }
 0x11c   :  { %v5525_v23 = vld [vmem:[%s6170_s14 + $0x20] sm:$0xff]  ;;  %v5532_v24 = vld [vmem:[%s6170_s14 + $0x28] sm:$0xff]  ;;  %v5535_v25 = vld [vmem:[%s6170_s14 + $0x30] sm:$0xff]  ;;  %s2812_s5 = sld [smem:[#allocation3]] }
 0x11d   :  { %v5542_v26 = vld [vmem:[%s6170_s14 + $0x38] sm:$0xff]  ;;  %v360_v28 = vld [vmem:[%s6171_s22 + $0x10] sm:$0xff]  ;;  %v359_v29 = vld [vmem:[%s6171_s22 + $0x8] sm:$0xff]  ;;  %s3881_s7 = sld [smem:[#allocation3 + $0x2]] }
 0x11e   :  { %4245 = vmatmul.mubr.msk.f32.gmra.mxu1 %vm363_vm1, %v342_v6  ;;  %v361_v27 = vld [vmem:[%s6171_s22 + $0x18] sm:$0xff]  ;;  %v358_v30 = vld [vmem:[%s6171_s22] sm:$0xff]  ;;  %v883_v31 = vld [vmem:[%s6172_s3 + $0x8] sm:$0xff]  ;;  %s3885_s6 = sld [smem:[#allocation3 + $0x3]] }
 0x11f   :  { %4247 = vmatprep.mubr.msk.f32.mxu1 %vm363_vm1, %v343_v7  ;;  %4281 = vmatprep.subr.mxu0 %v361_v27  ;;  %v882_v33 = vld [vmem:[%s6172_s3] sm:$0xff]  ;;  %v886_v2 = vld [vmem:[%s6174_s19 + $0x8] sm:$0xff]  ;;  %s6009_s15 = sld [smem:[#allocation3 + $0x4]] }
 0x120   :  { %4282 = vmatpush3.msra.mxu0 %v361_v27  ;;  %901 = vperm.xlu0 %4821, %v883_v31   ;;  %v3798_v61 = vld [vmem:[%s6173_s28] ss:$0 sm:$0xff]  ;;  %s6011_s21 = sld [smem:[#allocation3 + $0x5]] }
 0x121   :  { %4283 = vmatprep.subr.mxu0 %v360_v28  ;;  %vm895_vm4 = vcmp.eq.s32.totalorder %v5563_v60, %v3798_v61  ;;  %v885_v0 = vld [vmem:[%s6174_s19] sm:$0xff]  ;;  %s3906_s27 = sshll.u32 %s3877_s1, 4  ;;  %s6017_s12 = sld [smem:[#allocation3 + $0x6]] }
 0x122   :  { %4248 = vmatmul.mubr.msk.f32.gmra.mxu1 %vm363_vm1, %v344_v8  ;;  %4284 = vmatpush3.msra.mxu0 %v360_v28  ;;  %v5568_v63 = vsel %vm895_vm4, 1.0, %v5293_v62  ;;  %v1412_v61 = vld [vmem:[#allocation17 + $0x10] sm:$0xff]  ;;  %s2901_s8 = scalar_lea.vmem [#allocation26], %s3906_s27  ;;  %s3905_s29 = sshll.u32 %s2812_s5, 4 }
 0x123   :  { %4250 = vmatprep.mubr.msk.f32.mxu1 %vm363_vm1, %v345_v9  ;;  %4285 = vmatprep.subr.mxu0 %v359_v29  ;;  %v993_v1 = vsel %vm919_vm5, %v5568_v63, 0.0  ;;  %s2815_s10 = scalar_lea.vmem [#allocation26], %s3905_s29  ;;  %s3907_s11 = sshll.u32 %s3881_s7, 4 }
 0x124   :  { %4286 = vmatpush3.msra.mxu0 %v359_v29  ;;  %898 = vperm.xlu0 %4821, %v882_v33   ;;  %s3908_s17 = sshll.u32 %s3885_s6, 4  ;;  %s2987_s16 = scalar_lea.vmem [#allocation26], %s3907_s11 }
 0x125   :  { %4287 = vmatprep.subr.mxu0 %v358_v30  ;;  %908 = vperm.xlu1 %4822, %v885_v0   ;;  %s3073_s18 = scalar_lea.vmem [#allocation26], %s3908_s17  ;;  %s3909_s24 = sshll.u32 %s6009_s15, 4 }
 0x126   :  { %4251 = vmatmul.mubr.msk.f32.gmra.mxu1 %vm363_vm1, %v346_v10  ;;  %4288 = vmatpush3.msra.mxu0 %v358_v30  ;;  %s3910_s0 = sshll.u32 %s6011_s21, 4  ;;  %s6027_s14 = sld [smem:[#allocation3 + $0x7]] }
 0x127   :  { %4269 = vmatprep.mubr.msk.f32.mxu1 %vm503_vm2, %v5510_v11  ;;  %s3159_s22 = scalar_lea.vmem [#allocation26], %s3909_s24  ;;  %s3245_s3 = scalar_lea.vmem [#allocation26], %s3910_s0 }
 0x128   :  { %s3911_s28 = sshll.u32 %s6017_s12, 4 }
 0x129   :  { %911 = vperm.xlu1 %4822, %v886_v2  }
 0x12c   :  { %s3912_s19 = sshll.u32 %s6027_s14, 4 }
 0x143   :  { %994 = vadd.xlane.f32.xlu0 %v993_v1  ;;  %v1410_v1 = vld [vmem:[#allocation17] sm:$0xff] }
 0x1da   :  { %v4243_v12 = vpop.f32.mrf.mxu1 }
 0x1dc   :  { %v458_v13 = vpop.f32.mrf.mxu1 }
 0x1de   :  { %v4246_v14 = vpop.f32.mrf.mxu1 }
 0x1e0   :  { %v468_v15 = vpop.f32.mrf.mxu1 }
 0x1e2   :  { %v4249_v16 = vpop.f32.mrf.mxu1 }
 0x1e4   :  { %v478_v17 = vpop.f32.mrf.mxu1 }
 0x1e6   :  { %v4252_v18 = vpop.f32.mrf.mxu1 }
 0x1e7   :  { %4253 = vmatprep.subr.mxu1 %v4252_v18 }
 0x1e8   :  { %v488_v19 = vpop.f32.mrf.mxu1  ;;  %4254 = vmatpush3.msra.mxu1 %v4252_v18  ;;  %v1019_v18 = vld [vmem:[%s6176_s23 + $0x18] sm:$0xff] }
 0x1e9   :  { %4255 = vmatprep.subr.mxu1 %v488_v19 }
 0x1ea   :  { %4256 = vmatpush3.msra.mxu1 %v488_v19  ;;  %v1018_v19 = vld [vmem:[%s6176_s23 + $0x10] sm:$0xff] }
 0x1eb   :  { %4257 = vmatprep.subr.mxu1 %v4249_v16 }
 0x1ec   :  { %4258 = vmatpush3.msra.mxu1 %v4249_v16  ;;  %v1013_v16 = vld [vmem:[#allocation11] sm:$0xff] }
 0x1ed   :  { %4259 = vmatprep.subr.mxu1 %v478_v17 }
 0x1ee   :  { %4260 = vmatpush3.msra.mxu1 %v478_v17  ;;  %v1012_v17 = vld [vmem:[%s6175_s2] sm:$0xff]  ;;  %s3331_s2 = scalar_lea.vmem [#allocation26], %s3911_s28 }
 0x1ef   :  { %4261 = vmatprep.subr.mxu1 %v4246_v14 }
 0x1f0   :  { %4262 = vmatpush3.msra.mxu1 %v4246_v14  ;;  %v5294_v14 = vmov 1.0  }
 0x1f1   :  { %4263 = vmatprep.subr.mxu1 %v468_v15 }
 0x1f2   :  { %4264 = vmatpush3.msra.mxu1 %v468_v15  ;;  %v1014_v15 = vld [vmem:[#allocation11 + $0x8] sm:$0xf] }
 0x1f3   :  { %4265 = vmatprep.subr.mxu1 %v4243_v12 }
 0x1f4   :  { %4266 = vmatpush3.msra.mxu1 %v4243_v12  ;;  %v5574_v12 = vand.u32 127, %v887_v59 }
 0x1f5   :  { %4267 = vmatprep.subr.mxu1 %v458_v13 }
 0x1f6   :  { %4268 = vmatpush3.msra.mxu1 %v458_v13  ;;  %vm917_vm12 = vcmp.eq.s32.totalorder %v5563_v60, %v5574_v12 }
 0x1f7   :  { %4270 = vmatmul.mubr.msk.f32.vlgmr.msra.gmra.mxu1 %vm503_vm2, %v5515_v20 }
 0x1f8   :  { %4272 = vmatprep.mubr.msk.f32.mxu1 %vm503_vm2, %v349_v21 }
 0x1fb   :  { %4273 = vmatmul.mubr.msk.f32.gmra.mxu1 %vm503_vm2, %v5522_v22 }
 0x1fc   :  { %4275 = vmatprep.mubr.msk.f32.mxu1 %vm503_vm2, %v5525_v23 }
 0x1ff   :  { %4276 = vmatmul.mubr.msk.f32.gmra.mxu1 %vm503_vm2, %v5532_v24 }
 0x200   :  { %4278 = vmatprep.mubr.msk.f32.mxu1 %vm503_vm2, %v5535_v25 }
 0x203   :  { %4279 = vmatmul.mubr.msk.f32.gmra.mxu1 %vm503_vm2, %v5542_v26 }
 0x204   :  { %4320 = vmatprep.mubr.msk.f32.mxu1 %vm503_vm2, %v349_v21 }
 0x2b7   :  { %v4271_v35 = vpop.f32.mrf.mxu1 }
 0x2b8   :  { %v600_v36 = vadd.f32 %v4271_v35, %v3772_v34 }
 0x2b9   :  { %v594_v37 = vpop.f32.mrf.mxu1 }
 0x2ba   :  { %v595_v38 = vadd.f32 %v3772_v34, %v594_v37  ;;  %v634_v41 = vmax.f32 %v600_v36, 0.0 }
 0x2bb   :  { %v4274_v39 = vpop.f32.mrf.mxu1 }
 0x2bc   :  { %v633_v40 = vmax.f32 %v595_v38, 0.0  ;;  %v610_v42 = vadd.f32 %v4274_v39, %v3772_v34  ;;  %v918_v38 = vsel %vm917_vm12, 1.0, %v5293_v62 }
 0x2bd   :  { %v604_v43 = vpop.f32.mrf.mxu1 }
 0x2be   :  { %v605_v44 = vadd.f32 %v3772_v34, %v604_v43  ;;  %4289 = vmatprep.mubr.msk.f32.mxu0 %vm641_vm3, %v633_v40  ;;  %v636_v47 = vmax.f32 %v610_v42, 0.0 }
 0x2bf   :  { %v4277_v45 = vpop.f32.mrf.mxu1  ;;  %4290 = vmatmul.mubr.msk.f32.vlgmr.msra.gmra.mxu0 %vm641_vm3, %v634_v41 }
 0x2c0   :  { %v635_v46 = vmax.f32 %v605_v44, 0.0  ;;  %v620_v48 = vadd.f32 %v4277_v45, %v3772_v34 }
 0x2c1   :  { %v614_v49 = vpop.f32.mrf.mxu1 }
 0x2c2   :  { %v615_v50 = vadd.f32 %v3772_v34, %v614_v49  ;;  %4292 = vmatprep.mubr.msk.f32.mxu0 %vm641_vm3, %v635_v46  ;;  %v638_v53 = vmax.f32 %v620_v48, 0.0  ;;  %v1017_v48 = vld [vmem:[%s6176_s23 + $0x8] sm:$0xff]  ;;  %v1016_v49 = vld [vmem:[%s6176_s23] sm:$0xff]  ;;  %s3417_s23 = scalar_lea.vmem [#allocation26], %s3912_s19 }
 0x2c3   :  { %v4280_v51 = vpop.f32.mrf.mxu1  ;;  %4293 = vmatmul.mubr.msk.f32.gmra.mxu0 %vm641_vm3, %v636_v47 }
 0x2c4   :  { %v637_v52 = vmax.f32 %v615_v50, 0.0  ;;  %v630_v54 = vadd.f32 %v4280_v51, %v3772_v34  ;;  %v1413_v50 = vld [vmem:[#allocation17 + $0x18] sm:$0xff] }
 0x2c5   :  { %v624_v55 = vpop.f32.mrf.mxu1 }
 0x2c6   :  { %v625_v56 = vadd.f32 %v3772_v34, %v624_v55  ;;  %4295 = vmatprep.mubr.msk.f32.mxu0 %vm641_vm3, %v637_v52  ;;  %v640_v58 = vmax.f32 %v630_v54, 0.0  ;;  %v3804_v52 = vld [vmem:[#allocation13] ss:$0 sm:$0xff] }
 0x2c7   :  { %4296 = vmatmul.mubr.msk.f32.gmra.mxu0 %vm641_vm3, %v638_v53 }
 0x2c8   :  { %v639_v57 = vmax.f32 %v625_v56, 0.0 }
 0x2ca   :  { %4298 = vmatprep.mubr.msk.f32.mxu0 %vm641_vm3, %v639_v57  ;;  %v3789_v57 = vld [vmem:[#allocation10] ss:$0 sm:$0xff] }
 0x2cb   :  { %4299 = vmatmul.mubr.msk.f32.gmra.mxu0 %vm641_vm3, %v640_v58 }
 0x2cc   :  { %4317 = vmatprep.mubr.msk.f32.mxu0 %vm503_vm2, %v5510_v11  ;;  %v902_v11 = vpop.permute.xlu0 %901 }
 0x2cd   :  { %vm904_vm6 = vcmp.eq.s32.totalorder %v5574_v12, %v902_v11 }
 0x2d0   :  { %v899_v13 = vpop.permute.xlu0 %898 }
 0x2d1   :  { %vm903_vm8 = vcmp.eq.s32.totalorder %v5574_v12, %v899_v13 }
 0x2d4   :  { %v995_v32 = vpop.xlane.xlu0 %994 }
 0x2d5   :  { %v996_v34 = vadd.f32 1.0, %v995_v32 }
 0x2d7   :  { %4823 = vrsqrt.f32 %v996_v34  ;;  %v1553_v34 = vld [vmem:[#allocation20 + $0x18] sm:$0xff] }
 0x2e4   :  { %v4824_v39 = vpop.eup %4823 }
 0x37f   :  { %v4291_v3 = vpop.f32.mrf.mxu0 }
 0x381   :  { %v732_v4 = vpop.f32.mrf.mxu0 }
 0x383   :  { %v4294_v5 = vpop.f32.mrf.mxu0 }
 0x385   :  { %v742_v6 = vpop.f32.mrf.mxu0 }
 0x387   :  { %v4297_v7 = vpop.f32.mrf.mxu0 }
 0x389   :  { %v752_v8 = vpop.f32.mrf.mxu0 }
 0x38b   :  { %v4300_v9 = vpop.f32.mrf.mxu0 }
 0x38c   :  { %4301 = vmatprep.subr.mxu0 %v4300_v9  ;;  %4745 = vmatprep.subr.mxu1 %v4300_v9 }
 0x38d   :  { %v762_v10 = vpop.f32.mrf.mxu0  ;;  %4302 = vmatpush3.msra.mxu0 %v4300_v9  ;;  %4753 = vmatpush3.msra.mxu1 %v4300_v9 }
 0x38e   :  { %4303 = vmatprep.subr.mxu0 %v762_v10  ;;  %4746 = vmatprep.subr.mxu1 %v762_v10 }
 0x38f   :  { %4304 = vmatpush3.msra.mxu0 %v762_v10  ;;  %4754 = vmatpush3.msra.mxu1 %v762_v10 }
 0x390   :  { %4305 = vmatprep.subr.mxu0 %v4297_v7  ;;  %4747 = vmatprep.subr.mxu1 %v4297_v7 }
 0x391   :  { %4306 = vmatpush3.msra.mxu0 %v4297_v7  ;;  %4755 = vmatpush3.msra.mxu1 %v4297_v7 }
 0x392   :  { %4307 = vmatprep.subr.mxu0 %v752_v8  ;;  %4748 = vmatprep.subr.mxu1 %v752_v8 }
 0x393   :  { %4308 = vmatpush3.msra.mxu0 %v752_v8  ;;  %4756 = vmatpush3.msra.mxu1 %v752_v8 }
 0x394   :  { %4309 = vmatprep.subr.mxu0 %v4294_v5  ;;  %4749 = vmatprep.subr.mxu1 %v4294_v5 }
 0x395   :  { %4310 = vmatpush3.msra.mxu0 %v4294_v5  ;;  %4757 = vmatpush3.msra.mxu1 %v4294_v5 }
 0x396   :  { %4311 = vmatprep.subr.mxu0 %v742_v6  ;;  %4750 = vmatprep.subr.mxu1 %v742_v6 }
 0x397   :  { %4312 = vmatpush3.msra.mxu0 %v742_v6  ;;  %4758 = vmatpush3.msra.mxu1 %v742_v6 }
 0x398   :  { %4313 = vmatprep.subr.mxu0 %v4291_v3  ;;  %4751 = vmatprep.subr.mxu1 %v4291_v3 }
 0x399   :  { %4314 = vmatpush3.msra.mxu0 %v4291_v3  ;;  %4759 = vmatpush3.msra.mxu1 %v4291_v3 }
 0x39a   :  { %4315 = vmatprep.subr.mxu0 %v732_v4  ;;  %4752 = vmatprep.subr.mxu1 %v732_v4 }
 0x39b   :  { %4316 = vmatpush3.msra.mxu0 %v732_v4  ;;  %4760 = vmatpush3.msra.mxu1 %v732_v4 }
 0x39c   :  { %4318 = vmatmul.mubr.msk.f32.vlgmr.msra.gmra.mxu0 %vm503_vm2, %v5515_v20  ;;  %4329 = vmatprep.subr.mxu0 %v5293_v62  ;;  %v909_v20 = vpop.permute.xlu1 %908 }
 0x39d   :  { %4330 = vmatpush3.msk.msra.mxu0 %vm904_vm6, %v5294_v14  ;;  %4333 = vmatprep.mubr.msk.f32.mxu0 %vm5295_vm7, %v5293_v62  ;;  %vm913_vm9 = vcmp.eq.s32.totalorder %v5574_v12, %v909_v20 }
 0x39e   :  { %4331 = vmatprep.subr.mxu0 %v5293_v62  ;;  %4321 = vmatmul.mubr.msk.f32.vlgmr.msra.gmra.mxu1 %vm503_vm2, %v5522_v22  ;;  %v915_v22 = vsel %vm913_vm9, 1.0, %v5293_v62 }
 0x39f   :  { %4332 = vmatpush3.msk.msra.mxu0 %vm903_vm8, %v5294_v14  ;;  %4323 = vmatprep.mubr.msk.f32.mxu1 %vm503_vm2, %v5525_v23  ;;  %v1328_v14 = vld [vmem:[%s6177_s20 + $0x10] sm:$0xff] }
 0x3a0   :  { %4334 = vmatmul.mubr.msk.f32.vlgmr.msra.gmra.mxu0 %vm919_vm5, %v5568_v63  ;;  %4336 = vmatprep.subr.mxu0 %v5293_v62  ;;  %v912_v21 = vpop.permute.xlu1 %911  ;;  %v1411_v63 = vld [vmem:[#allocation17 + $0x8] sm:$0xff] }
 0x3a1   :  { %4337 = vmatpush3.msk.msra.mxu0 %vm388_vm0, %v1014_v15  ;;  %4340 = vmatprep.mubr.msk.f32.mxu0 %vm5295_vm7, %v5293_v62  ;;  %vm914_vm10 = vcmp.eq.s32.totalorder %v5574_v12, %v912_v21  ;;  %v1329_v12 = vld [vmem:[%s6177_s20 + $0x18] sm:$0xff]  ;;  %v1327_v15 = vld [vmem:[%s6177_s20 + $0x8] sm:$0xff] }
 0x3a2   :  { %4338 = vmatprep.subr.mxu0 %v5293_v62  ;;  %4324 = vmatmul.mubr.msk.f32.gmra.mxu1 %vm503_vm2, %v5532_v24  ;;  %v916_v23 = vsel %vm914_vm10, 1.0, %v5293_v62  ;;  %v998_v24 = vsel %vm997_vm11, %v915_v22, 0.0  ;;  %v3811_v22 = vld [vmem:[#allocation19] ss:$0 sm:$0xff] }
 0x3a3   :  { %4339 = vmatpush3.msra.mxu0 %v1013_v16  ;;  %4326 = vmatprep.mubr.msk.f32.mxu1 %vm503_vm2, %v5535_v25  ;;  %v999_v25 = vsel %vm997_vm11, %v916_v23, 0.0 }
 0x3a4   :  { %4341 = vmatmul.mubr.msk.f32.vlgmr.msra.gmra.mxu0 %vm363_vm1, %v1012_v17  ;;  %4343 = vmatprep.subr.mxu0 %v5293_v62 }
 0x3a5   :  { %4345 = vmatprep.mubr.msk.f32.mxu0 %vm5295_vm7, %v5293_v62  ;;  %4348 = vmatprep.subr.mxu1 %v5293_v62 }
 0x3a6   :  { %4327 = vmatmul.mubr.msk.f32.gmra.mxu1 %vm503_vm2, %v5542_v26  ;;  %v1000_v26 = vadd.f32 %v999_v25, %v998_v24 }
 0x3a7   :  { %4356 = vmatprep.mubr.msk.f32.mxu1 %vm5295_vm7, %v5293_v62  ;;  %4349 = vmatpush3.msra.mxu1 %v1019_v18 }
 0x3a8   :  { %4350 = vmatprep.subr.mxu1 %v5293_v62  ;;  %v1001_v27 = vrot.slane %v1000_v26, 4 }
 0x3a9   :  { %4351 = vmatpush3.msra.mxu1 %v1018_v19 }
 0x3aa   :  { %4352 = vmatprep.subr.mxu1 %v5293_v62  ;;  %v1002_v28 = vadd.f32 %v1001_v27, %v1000_v26 }
 0x3ab   :  { %4353 = vmatpush3.msra.mxu1 %v1017_v48 }
 0x3ac   :  { %v1003_v29 = vrot.slane %v1002_v28, 2  ;;  %4354 = vmatprep.subr.mxu1 %v5293_v62 }
 0x3ad   :  { %4355 = vmatpush3.msra.mxu1 %v1016_v49 }
 0x3ae   :  { %v1004_v30 = vadd.f32 %v1003_v29, %v1002_v28  ;;  %4375 = vmatprep.subr.mxu1 %v1413_v50 }
 0x3b0   :  { %v1005_v31 = vrot.slane %v1004_v30, 1 }
 0x3b2   :  { %v1006_v33 = vadd.f32 %v1005_v31, %v1004_v30 }
 0x3b4   :  { %v1007_v35 = vadd.f32 1.0, %v1006_v33  ;;  %v1326_v33 = vld [vmem:[%s6177_s20] sm:$0xff]  ;;  %s6178_s20 = sld [smem:[#allocation57_spill]] }
 0x3b6   :  { %4825 = vrsqrt.f32 %v1007_v35  ;;  %v3807_v35 = vld [vmem:[#allocation14] ss:$0 sm:$0xff] }
 0x3c3   :  { %v4826_v44 = vpop.eup %4825 }
 0x45c   :  { %v4319_v36 = vpop.f32.mrf.mxu0 }
 0x45d   :  { %v5636_v3 = vadd.f32 %v4319_v36, %v3789_v57 }
 0x45e   :  { %v843_v37 = vpop.f32.mrf.mxu0  ;;  %v4322_v51 = vpop.f32.mrf.mxu1 }
 0x45f   :  { %v5629_v60 = vadd.f32 %v3789_v57, %v843_v37  ;;  %v5638_v5 = vadd.f32 %v4322_v51, %v3789_v57 }
 0x460   :  { %v989_v40 = vpop.f32.mrf.mxu0  ;;  %v853_v53 = vpop.f32.mrf.mxu1 }
 0x461   :  { %v990_v41 = vadd.f32 %v989_v40, %v918_v38  ;;  %v5634_v2 = vadd.f32 %v3789_v57, %v853_v53  ;;  %v1551_v40 = vld [vmem:[#allocation20 + $0x8] sm:$0xff] }
 0x462   :  { %v4335_v42 = vpop.f32.mrf.mxu0  ;;  %v4325_v59 = vpop.f32.mrf.mxu1 }
 0x463   :  { %v1009_v43 = vmul.f32 %v4824_v39, %v990_v41  ;;  %v5647_v8 = vadd.f32 %v4325_v59, %v3789_v57  ;;  %v1552_v39 = vld [vmem:[#allocation20 + $0x10] sm:$0xff]  ;;  %v1550_v41 = vld [vmem:[#allocation20] sm:$0xff]  ;;  %v3809_v42 = vld [vmem:[#allocation16] ss:$0 sm:$0xff] }
 0x464   :  { %v1093_v45 = vpop.f32.mrf.mxu0  ;;  %v863_v0 = vpop.f32.mrf.mxu1 }
 0x465   :  { %v1011_v46 = vmul.f32 %v4826_v44, %v1009_v43  ;;  %4344 = vmatpush3.msra.mxu0 %v1093_v45  ;;  %v5645_v6 = vadd.f32 %v3789_v57, %v863_v0 }
 0x466   :  { %v4342_v47 = vpop.f32.mrf.mxu0  ;;  %4359 = vmatprep.subr.mxu0 %v5293_v62  ;;  %v4328_v4 = vpop.f32.mrf.mxu1 }
 0x467   :  { %4346 = vmatmul.mubr.msk.f32.vlgmr.msra.gmra.mxu0 %vm997_vm11, %v1011_v46  ;;  %v5655_v10 = vadd.f32 %v4328_v4, %v3789_v57 }
 0x468   :  { %4361 = vmatprep.mubr.msk.f32.mxu0 %vm5295_vm7, %v5293_v62  ;;  %v873_v7 = vpop.f32.mrf.mxu1 }
 0x469   :  { %v5653_v9 = vadd.f32 %v3789_v57, %v873_v7 }
 0x527   :  { %v1172_v54 = vpop.f32.mrf.mxu0 }
 0x528   :  { %v1173_v55 = vadd.f32 %v3804_v52, %v1172_v54  ;;  %v3820_v52 = vld [vmem:[#allocation22] ss:$0 sm:$0xff] }
 0x529   :  { %v4347_v56 = vpop.f32.mrf.mxu0 }
 0x52a   :  { %v1176_v58 = vmax.f32 %v1173_v55, 0.0 }
 0x52c   :  { %4357 = vmatmul.mubr.msk.f32.vlgmr.msra.gmra.mxu1 %vm641_vm3, %v1176_v58 }
 0x52d   :  { %4376 = vmatpush3.msra.mxu1 %v1413_v50  ;;  %4383 = vmatprep.mubr.msk.f32.mxu1 %vm641_vm3, %v5629_v60 }
 0x52e   :  { %4377 = vmatprep.subr.mxu1 %v1412_v61 }
 0x52f   :  { %4378 = vmatpush3.msra.mxu1 %v1412_v61 }
 0x530   :  { %4379 = vmatprep.subr.mxu1 %v1411_v63 }
 0x531   :  { %4380 = vmatpush3.msra.mxu1 %v1411_v63 }
 0x532   :  { %4381 = vmatprep.subr.mxu1 %v1410_v1 }
 0x533   :  { %4382 = vmatpush3.msra.mxu1 %v1410_v1 }
 0x534   :  { %4384 = vmatmul.mubr.msk.f32.vlgmr.msra.gmra.mxu1 %vm641_vm3, %v5636_v3  ;;  %4415 = vmatprep.subr.mxu1 %v5293_v62 }
 0x535   :  { %4386 = vmatprep.mubr.msk.f32.mxu1 %vm641_vm3, %v5634_v2 }
 0x538   :  { %4387 = vmatmul.mubr.msk.f32.gmra.mxu1 %vm641_vm3, %v5638_v5 }
 0x539   :  { %4389 = vmatprep.mubr.msk.f32.mxu1 %vm641_vm3, %v5645_v6 }
 0x53c   :  { %4390 = vmatmul.mubr.msk.f32.gmra.mxu1 %vm641_vm3, %v5647_v8 }
 0x53d   :  { %4392 = vmatprep.mubr.msk.f32.mxu1 %vm641_vm3, %v5653_v9 }
 0x540   :  { %4393 = vmatmul.mubr.msk.f32.gmra.mxu1 %vm641_vm3, %v5655_v10 }
 0x541   :  { %4431 = vmatprep.mubr.msk.f32.mxu1 %vm5295_vm7, %v5293_v62 }
 0x5ec   :  { %v1246_v11 = vpop.f32.mrf.mxu1 }
 0x5ed   :  { %4360 = vmatpush3.msra.mxu0 %v1246_v11 }
 0x5ee   :  { %v4358_v13 = vpop.f32.mrf.mxu1  ;;  %4362 = vmatmul.mubr.msk.f32.vlgmr.msra.gmra.mxu0 %vm997_vm11, %v1011_v46  ;;  %4364 = vmatprep.subr.mxu0 %v5293_v62 }
 0x5ef   :  { %4365 = vmatpush3.msra.mxu0 %v1329_v12  ;;  %4372 = vmatprep.mubr.msk.f32.mxu0 %vm5295_vm7, %v5293_v62  ;;  %v1849_v12 = vld [vmem:[#allocation23] sm:$0xff] }
 0x5f0   :  { %4366 = vmatprep.subr.mxu0 %v5293_v62 }
 0x5f1   :  { %4367 = vmatpush3.msra.mxu0 %v1328_v14 }
 0x5f2   :  { %4368 = vmatprep.subr.mxu0 %v5293_v62 }
 0x5f3   :  { %4369 = vmatpush3.msra.mxu0 %v1327_v15 }
 0x5f4   :  { %v4385_v16 = vpop.f32.mrf.mxu1  ;;  %4370 = vmatprep.subr.mxu0 %v5293_v62 }
 0x5f5   :  { %v5705_v31 = vadd.f32 %v4385_v16, %v3811_v22  ;;  %4371 = vmatpush3.msra.mxu0 %v1326_v33 }
 0x5f6   :  { %v1511_v17 = vpop.f32.mrf.mxu1  ;;  %4395 = vmatprep.subr.mxu0 %v1553_v34 }
 0x5f7   :  { %v5710_v32 = vadd.f32 %v3811_v22, %v1511_v17 }
 0x5f8   :  { %v4388_v18 = vpop.f32.mrf.mxu1 }
 0x5f9   :  { %v5692_v29 = vadd.f32 %v4388_v18, %v3811_v22 }
 0x5fa   :  { %v1521_v19 = vpop.f32.mrf.mxu1 }
 0x5fb   :  { %v5697_v30 = vadd.f32 %v3811_v22, %v1521_v19 }
 0x5fc   :  { %v4391_v20 = vpop.f32.mrf.mxu1 }
 0x5fd   :  { %v5682_v27 = vadd.f32 %v4391_v20, %v3811_v22 }
 0x5fe   :  { %v1531_v21 = vpop.f32.mrf.mxu1 }
 0x5ff   :  { %v5687_v28 = vadd.f32 %v3811_v22, %v1531_v21 }
 0x600   :  { %v4394_v23 = vpop.f32.mrf.mxu1 }
 0x601   :  { %v5675_v24 = vadd.f32 %v4394_v23, %v3811_v22 }
 0x602   :  { %v1541_v25 = vpop.f32.mrf.mxu1 }
 0x603   :  { %4416 = vmatpush3.xpose.msk.msra.mxu1 %vm997_vm11, %v5675_v24  ;;  %v5679_v26 = vadd.f32 %v3811_v22, %v1541_v25 }
 0x604   :  { %4417 = vmatprep.subr.mxu1 %v5293_v62 }
 0x607   :  { %4418 = vmatpush3.xpose.msk.msra.mxu1 %vm997_vm11, %v5679_v26 }
 0x608   :  { %4419 = vmatprep.subr.mxu1 %v5293_v62 }
 0x60b   :  { %4420 = vmatpush3.xpose.msk.msra.mxu1 %vm997_vm11, %v5682_v27 }
 0x60c   :  { %4421 = vmatprep.subr.mxu1 %v5293_v62 }
 0x60f   :  { %4422 = vmatpush3.xpose.msk.msra.mxu1 %vm997_vm11, %v5687_v28 }
 0x610   :  { %4423 = vmatprep.subr.mxu1 %v5293_v62 }
 0x613   :  { %4424 = vmatpush3.xpose.msk.msra.mxu1 %vm997_vm11, %v5692_v29 }
 0x614   :  { %4425 = vmatprep.subr.mxu1 %v5293_v62 }
 0x617   :  { %4426 = vmatpush3.xpose.msk.msra.mxu1 %vm997_vm11, %v5697_v30 }
 0x618   :  { %4427 = vmatprep.subr.mxu1 %v5293_v62 }
 0x61b   :  { %4428 = vmatpush3.xpose.msk.msra.mxu1 %vm997_vm11, %v5705_v31 }
 0x61c   :  { %4429 = vmatprep.subr.mxu1 %v5293_v62 }
 0x61f   :  { %4430 = vmatpush3.xpose.msk.msra.mxu1 %vm997_vm11, %v5710_v32 }
 0x620   :  { %4477 = vmatprep.subr.mxu1 %v5293_v62 }
 0x6ae   :  { %v1322_v36 = vpop.f32.mrf.mxu0 }
 0x6af   :  { %v1323_v37 = vadd.f32 %v3807_v35, %v1322_v36 }
 0x6b0   :  { %v4363_v38 = vpop.f32.mrf.mxu0 }
 0x6b1   :  { %4373 = vmatmul.mubr.msk.f32.vlgmr.msra.gmra.mxu0 %vm641_vm3, %v1323_v37 }
 0x6b2   :  { %4396 = vmatpush3.msra.mxu0 %v1553_v34  ;;  %4403 = vmatprep.mubr.msk.f32.mxu0 %vm641_vm3, %v5629_v60 }
 0x6b3   :  { %4397 = vmatprep.subr.mxu0 %v1552_v39 }
 0x6b4   :  { %4398 = vmatpush3.msra.mxu0 %v1552_v39 }
 0x6b5   :  { %4399 = vmatprep.subr.mxu0 %v1551_v40 }
 0x6b6   :  { %4400 = vmatpush3.msra.mxu0 %v1551_v40 }
 0x6b7   :  { %4401 = vmatprep.subr.mxu0 %v1550_v41 }
 0x6b8   :  { %4402 = vmatpush3.msra.mxu0 %v1550_v41 }
 0x6b9   :  { %4404 = vmatmul.mubr.msk.f32.vlgmr.msra.gmra.mxu0 %vm641_vm3, %v5636_v3  ;;  %4434 = vmatprep.subr.mxu0 %v5293_v62 }
 0x6ba   :  { %4406 = vmatprep.mubr.msk.f32.mxu0 %vm641_vm3, %v5634_v2 }
 0x6bd   :  { %4407 = vmatmul.mubr.msk.f32.gmra.mxu0 %vm641_vm3, %v5638_v5 }
 0x6be   :  { %4409 = vmatprep.mubr.msk.f32.mxu0 %vm641_vm3, %v5645_v6 }
 0x6c1   :  { %4410 = vmatmul.mubr.msk.f32.gmra.mxu0 %vm641_vm3, %v5647_v8 }
 0x6c2   :  { %4412 = vmatprep.mubr.msk.f32.mxu0 %vm641_vm3, %v5653_v9 }
 0x6c5   :  { %4413 = vmatmul.mubr.msk.f32.gmra.mxu0 %vm641_vm3, %v5655_v10 }
 0x6c6   :  { %4450 = vmatprep.mubr.msk.f32.mxu0 %vm5295_vm7, %v5293_v62 }
 0x771   :  { %v1406_v43 = vpop.f32.mrf.mxu0 }
 0x772   :  { %v5736_v44 = vadd.f32 %v3809_v42, %v1406_v43 }
 0x773   :  { %v4374_v45 = vpop.f32.mrf.mxu0 }
 0x774   :  { %4432 = vmatmul.mubr.msk.f32.vlgmr.msra.gmra.mxu1 %vm997_vm11, %v5736_v44 }
 0x775   :  { %4493 = vmatprep.mubr.msk.f32.mxu1 %vm5295_vm7, %v5293_v62 }
 0x779   :  { %v4405_v46 = vpop.f32.mrf.mxu0 }
 0x77a   :  { %v5764_v61 = vadd.f32 %v4405_v46, %v3820_v52 }
 0x77b   :  { %v1627_v47 = vpop.f32.mrf.mxu0 }
 0x77c   :  { %v5768_v63 = vadd.f32 %v3820_v52, %v1627_v47 }
 0x77d   :  { %v4408_v48 = vpop.f32.mrf.mxu0 }
 0x77e   :  { %v5756_v59 = vadd.f32 %v4408_v48, %v3820_v52 }
 0x77f   :  { %v1637_v49 = vpop.f32.mrf.mxu0 }
 0x780   :  { %v5760_v60 = vadd.f32 %v3820_v52, %v1637_v49 }
 0x781   :  { %v4411_v50 = vpop.f32.mrf.mxu0 }
 0x782   :  { %v5748_v57 = vadd.f32 %v4411_v50, %v3820_v52 }
 0x783   :  { %v1647_v51 = vpop.f32.mrf.mxu0 }
 0x784   :  { %v5752_v58 = vadd.f32 %v3820_v52, %v1647_v51 }
 0x785   :  { %v4414_v53 = vpop.f32.mrf.mxu0 }
 0x786   :  { %v5742_v54 = vadd.f32 %v4414_v53, %v3820_v52 }
 0x787   :  { %v1657_v55 = vpop.f32.mrf.mxu0 }
 0x788   :  { %v5744_v56 = vadd.f32 %v3820_v52, %v1657_v55  ;;  %4435 = vmatpush3.msra.mxu0 %v5742_v54 }
 0x789   :  { %4436 = vmatprep.subr.mxu0 %v5293_v62 }
 0x78a   :  { %4437 = vmatpush3.msra.mxu0 %v5744_v56 }
 0x78b   :  { %4438 = vmatprep.subr.mxu0 %v5293_v62 }
 0x78c   :  { %4439 = vmatpush3.msra.mxu0 %v5748_v57 }
 0x78d   :  { %4440 = vmatprep.subr.mxu0 %v5293_v62 }
 0x78e   :  { %4441 = vmatpush3.msra.mxu0 %v5752_v58 }
 0x78f   :  { %4442 = vmatprep.subr.mxu0 %v5293_v62 }
 0x790   :  { %4443 = vmatpush3.msra.mxu0 %v5756_v59 }
 0x791   :  { %4444 = vmatprep.subr.mxu0 %v5293_v62 }
 0x792   :  { %4445 = vmatpush3.msra.mxu0 %v5760_v60 }
 0x793   :  { %4446 = vmatprep.subr.mxu0 %v5293_v62 }
 0x794   :  { %4447 = vmatpush3.msra.mxu0 %v5764_v61 }
 0x795   :  { %4448 = vmatprep.subr.mxu0 %v5293_v62 }
 0x796   :  { %4449 = vmatpush3.msra.mxu0 %v5768_v63 }
 0x797   :  { %4453 = vmatprep.subr.mxu0 %v5293_v62 }
 0x834   :  { %v1760_v0 = vpop.f32.mrf.mxu1 }
 0x835   :  { %v1764_v1 = vmul.f32 0.35355338, %v1760_v0 }
 0x836   :  { %v4433_v2 = vpop.f32.mrf.mxu1 }
 0x837   :  { %v1765_v3 = vsel %vm503_vm2, %v1764_v1, -inf }
 0x838   :  { %1766 = vmax.xlane.f32.xlu1 %v1765_v3 }
 0x849   :  { %1944 = vrot.lane.b32.xlu1 %v5679_v26, %s5296_s4 }
 0x84d   :  { %1942 = vrot.lane.b32.xlu1 %v5682_v27, %s5296_s4 }
 0x851   :  { %1938 = vrot.lane.b32.xlu1 %v5692_v29, %s5296_s4 }
 0x855   :  { %1934 = vrot.lane.b32.xlu1 %v5705_v31, %s5296_s4 }
 0x859   :  { %1930 = vrot.lane.b32.xlu1 %v5736_v44, %s5296_s4 }
 0x85d   :  { %2068 = vrot.lane.b32.xlu1 %v5744_v56, %s5296_s4 }
 0x861   :  { %2064 = vrot.lane.b32.xlu1 %v5752_v58, %s5296_s4 }
 0x865   :  { %2060 = vrot.lane.b32.xlu1 %v5760_v60, %s5296_s4 }
 0x8c1   :  { %v1767_v4 = vpop.xlane.xlu1 %1766 }
 0x8c2   :  { %v1768_v5 = vsub.f32 %v1764_v1, %v1767_v4 }
 0x8c4   :  { %v1769_v6 = vmul.f32 1.442695, %v1768_v5 }
 0x8c5   :  { %v1945_v16 = vpop.permute.xlu1 %1944 }
 0x8c6   :  { %4827 = vpow2.f32 %v1769_v6  ;;  %v2154_v6 = vld [vmem:[#allocation23 + $0x8] sm:$0xff] }
 0x8c9   :  { %v1943_v17 = vpop.permute.xlu1 %1942 }
 0x8cd   :  { %v1939_v19 = vpop.permute.xlu1 %1938 }
 0x8d1   :  { %v1935_v21 = vpop.permute.xlu1 %1934 }
 0x8d3   :  { %v4828_v7 = vpop.eup %4827 }
 0x8d4   :  { %v1771_v8 = vsel %vm503_vm2, %v4828_v7, 0.0 }
 0x8d5   :  { %1772 = vadd.xlane.f32.xlu0 %v1771_v8  ;;  %v1931_v23 = vpop.permute.xlu1 %1930 }
 0x8d9   :  { %v2069_v40 = vpop.permute.xlu1 %2068 }
 0x8dd   :  { %v2065_v43 = vpop.permute.xlu1 %2064 }
 0x8e1   :  { %v2061_v47 = vpop.permute.xlu1 %2060 }
 0x8eb   :  { %1946 = vrot.lane.b32.xlu0 %v5675_v24, %s5296_s4 }
 0x8ef   :  { %1940 = vrot.lane.b32.xlu0 %v5687_v28, %s5296_s4 }
 0x8f3   :  { %1936 = vrot.lane.b32.xlu0 %v5697_v30, %s5296_s4 }
 0x8f7   :  { %1932 = vrot.lane.b32.xlu0 %v5710_v32, %s5296_s4 }
 0x95e   :  { %v1773_v9 = vpop.xlane.xlu0 %1772 }
 0x95f   :  { %4829 = vrcp.f32 %v1773_v9 }
 0x962   :  { %v1947_v14 = vpop.permute.xlu0 %1946 }
 0x966   :  { %v1941_v18 = vpop.permute.xlu0 %1940 }
 0x96a   :  { %v1937_v20 = vpop.permute.xlu0 %1936 }
 0x96c   :  { %v4830_v10 = vpop.eup %4829 }
 0x96d   :  { %v1775_v11 = vmul.f32 %v4830_v10, %v4828_v7 }
 0x96e   :  { %v1933_v22 = vpop.permute.xlu0 %1932 }
 0x96f   :  { %4451 = vmatmul.mubr.msk.f32.vlgmr.msra.gmra.mxu0 %vm503_vm2, %v1775_v11 }
 0x970   :  { %4454 = vmatpush3.msra.mxu0 %v1849_v12  ;;  %4455 = vmatprep.mubr.msk.f32.mxu0 %vm5295_vm7, %v5293_v62 }
 0x971   :  { %4458 = vmatprep.subr.mxu0 %v5293_v62 }
 0xa2f   :  { %v1845_v13 = vpop.f32.mrf.mxu0 }
 0xa30   :  { %4456 = vmatmul.mubr.msk.f32.vlgmr.msra.gmra.mxu0 %vm997_vm11, %v1845_v13  ;;  %v3840_v13 = vld [vmem:[#allocation25] ss:$0 sm:$0xff] }
 0xa31   :  { %4459 = vmatpush3.xpose.msk.msra.mxu0 %vm997_vm11, %v1947_v14  ;;  %v4452_v15 = vpop.f32.mrf.mxu0  ;;  %4474 = vmatprep.mubr.msk.f32.mxu0 %vm5295_vm7, %v5293_v62 }
 0xa32   :  { %4460 = vmatprep.subr.mxu0 %v5293_v62 }
 0xa35   :  { %4461 = vmatpush3.xpose.msk.msra.mxu0 %vm997_vm11, %v1945_v16 }
 0xa36   :  { %4462 = vmatprep.subr.mxu0 %v5293_v62 }
 0xa39   :  { %4463 = vmatpush3.xpose.msk.msra.mxu0 %vm997_vm11, %v1943_v17 }
 0xa3a   :  { %4464 = vmatprep.subr.mxu0 %v5293_v62 }
 0xa3d   :  { %4465 = vmatpush3.xpose.msk.msra.mxu0 %vm997_vm11, %v1941_v18 }
 0xa3e   :  { %4466 = vmatprep.subr.mxu0 %v5293_v62 }
 0xa41   :  { %4467 = vmatpush3.xpose.msk.msra.mxu0 %vm997_vm11, %v1939_v19 }
 0xa42   :  { %4468 = vmatprep.subr.mxu0 %v5293_v62 }
 0xa45   :  { %4469 = vmatpush3.xpose.msk.msra.mxu0 %vm997_vm11, %v1937_v20 }
 0xa46   :  { %4470 = vmatprep.subr.mxu0 %v5293_v62 }
 0xa49   :  { %4471 = vmatpush3.xpose.msk.msra.mxu0 %vm997_vm11, %v1935_v21 }
 0xa4a   :  { %4472 = vmatprep.subr.mxu0 %v5293_v62 }
 0xa4d   :  { %4473 = vmatpush3.xpose.msk.msra.mxu0 %vm997_vm11, %v1933_v22 }
 0xa4e   :  { %4520 = vmatprep.subr.mxu0 %v5293_v62 }
 0xa50   :  { %4475 = vmatmul.mubr.msk.f32.vlgmr.msra.gmra.mxu0 %vm997_vm11, %v1931_v23 }
 0xa51   :  { %4536 = vmatprep.mubr.msk.f32.mxu0 %vm5295_vm7, %v5293_v62 }
 0xaf0   :  { %v5826_v25 = vpop.f32.mrf.mxu0 }
 0xaf1   :  { %v1929_v14 = vadd.f32 %v3840_v13, %v5826_v25  ;;  %v3977_v13 = vld [vmem:[%s2815_s10 + $0x8] sm:$0xff]  }
 0xaf2   :  { %v4457_v33 = vpop.f32.mrf.mxu0 }
 0xb10   :  { %v2032_v34 = vpop.f32.mrf.mxu0 }
 0xb11   :  { %v2036_v35 = vmul.f32 0.35355338, %v2032_v34 }
 0xb12   :  { %v4476_v36 = vpop.f32.mrf.mxu0 }
 0xb13   :  { %v2037_v37 = vsel %vm503_vm2, %v2036_v35, -inf }
 0xb14   :  { %2038 = vmax.xlane.f32.xlu0 %v2037_v37  ;;  %v2445_v37 = vld [vmem:[#allocation23 + $0x10] sm:$0xff] }
 0xb2a   :  { %2070 = vrot.lane.b32.xlu0 %v5742_v54, %s5296_s4 }
 0xb2e   :  { %2066 = vrot.lane.b32.xlu0 %v5748_v57, %s5296_s4 }
 0xb32   :  { %2062 = vrot.lane.b32.xlu0 %v5756_v59, %s5296_s4 }
 0xb36   :  { %2058 = vrot.lane.b32.xlu0 %v5764_v61, %s5296_s4 }
 0xb3a   :  { %2245 = vrot.lane.b32.xlu0 %v5675_v24, %s5297_s26 }
 0xb3e   :  { %2241 = vrot.lane.b32.xlu0 %v5682_v27, %s5297_s26 }
 0xb42   :  { %2237 = vrot.lane.b32.xlu0 %v5692_v29, %s5297_s26 }
 0xb46   :  { %2233 = vrot.lane.b32.xlu0 %v5705_v31, %s5297_s26 }
 0xb4a   :  { %2229 = vrot.lane.b32.xlu0 %v5736_v44, %s5297_s26 }
 0xb4e   :  { %2361 = vrot.lane.b32.xlu0 %v5742_v54, %s5297_s26 }
 0xb52   :  { %2355 = vrot.lane.b32.xlu0 %v5752_v58, %s5297_s26 }
 0xb56   :  { %2351 = vrot.lane.b32.xlu0 %v5760_v60, %s5297_s26 }
 0xb9d   :  { %v2039_v38 = vpop.xlane.xlu0 %2038 }
 0xb9e   :  { %v2040_v39 = vsub.f32 %v2036_v35, %v2039_v38 }
 0xba0   :  { %v2041_v41 = vmul.f32 1.442695, %v2040_v39 }
 0xba1   :  { %v2071_v42 = vpop.permute.xlu0 %2070 }
 0xba2   :  { %4831 = vpow2.f32 %v2041_v41  ;;  %4478 = vmatpush3.msra.mxu1 %v2071_v42 }
 0xba3   :  { %4479 = vmatprep.subr.mxu1 %v5293_v62 }
 0xba4   :  { %4480 = vmatpush3.msra.mxu1 %v2069_v40 }
 0xba5   :  { %v2067_v45 = vpop.permute.xlu0 %2066  ;;  %4481 = vmatprep.subr.mxu1 %v5293_v62 }
 0xba6   :  { %4482 = vmatpush3.msra.mxu1 %v2067_v45 }
 0xba7   :  { %4483 = vmatprep.subr.mxu1 %v5293_v62 }
 0xba8   :  { %4484 = vmatpush3.msra.mxu1 %v2065_v43 }
 0xba9   :  { %v2063_v46 = vpop.permute.xlu0 %2062  ;;  %4485 = vmatprep.subr.mxu1 %v5293_v62 }
 0xbaa   :  { %4486 = vmatpush3.msra.mxu1 %v2063_v46 }
 0xbab   :  { %4487 = vmatprep.subr.mxu1 %v5293_v62 }
 0xbac   :  { %4488 = vmatpush3.msra.mxu1 %v2061_v47 }
 0xbad   :  { %v2059_v48 = vpop.permute.xlu0 %2058  ;;  %4489 = vmatprep.subr.mxu1 %v5293_v62 }
 0xbae   :  { %4490 = vmatpush3.msra.mxu1 %v2059_v48 }
 0xbaf   :  { %v4832_v49 = vpop.eup %4831  ;;  %4491 = vmatprep.subr.mxu1 %v5293_v62 }
 0xbb0   :  { %v2043_v50 = vsel %vm503_vm2, %v4832_v49, 0.0 }
 0xbb1   :  { %2044 = vadd.xlane.f32.xlu1 %v2043_v50  ;;  %v2246_v51 = vpop.permute.xlu0 %2245 }
 0xbb5   :  { %v2242_v52 = vpop.permute.xlu0 %2241 }
 0xbb9   :  { %v2238_v53 = vpop.permute.xlu0 %2237 }
 0xbbd   :  { %v2234_v55 = vpop.permute.xlu0 %2233 }
 0xbc1   :  { %v2230_v0 = vpop.permute.xlu0 %2229 }
 0xbc2   :  { %2056 = vrot.lane.b32.xlu1 %v5768_v63, %s5296_s4 }
 0xbc5   :  { %v2362_v1 = vpop.permute.xlu0 %2361 }
 0xbc6   :  { %2243 = vrot.lane.b32.xlu1 %v5679_v26, %s5297_s26  ;;  %4521 = vmatpush3.msra.mxu0 %v2362_v1 }
 0xbc7   :  { %4522 = vmatprep.subr.mxu0 %v5293_v62 }
 0xbca   :  { %2239 = vrot.lane.b32.xlu1 %v5687_v28, %s5297_s26 }
 0xbce   :  { %2235 = vrot.lane.b32.xlu1 %v5697_v30, %s5297_s26 }
 0xbd2   :  { %2231 = vrot.lane.b32.xlu1 %v5710_v32, %s5297_s26 }
 0xc3a   :  { %v2045_v2 = vpop.xlane.xlu1 %2044 }
 0xc3b   :  { %4833 = vrcp.f32 %v2045_v2 }
 0xc3e   :  { %v2057_v3 = vpop.permute.xlu1 %2056 }
 0xc3f   :  { %4492 = vmatpush3.msra.mxu1 %v2057_v3 }
 0xc40   :  { %4496 = vmatprep.subr.mxu1 %v5293_v62 }
 0xc42   :  { %v2244_v9 = vpop.permute.xlu1 %2243 }
 0xc46   :  { %v2240_v10 = vpop.permute.xlu1 %2239 }
 0xc48   :  { %v4834_v4 = vpop.eup %4833 }
 0xc49   :  { %v2047_v5 = vmul.f32 %v4834_v4, %v4832_v49 }
 0xc4a   :  { %v2236_v11 = vpop.permute.xlu1 %2235 }
 0xc4b   :  { %4494 = vmatmul.mubr.msk.f32.vlgmr.msra.gmra.mxu1 %vm503_vm2, %v2047_v5 }
 0xc4c   :  { %4497 = vmatpush3.msra.mxu1 %v2154_v6  ;;  %4498 = vmatprep.mubr.msk.f32.mxu1 %vm5295_vm7, %v5293_v62 }
 0xc4d   :  { %4501 = vmatprep.subr.mxu1 %v5293_v62 }
 0xc4e   :  { %v2232_v12 = vpop.permute.xlu1 %2231 }
 0xd0b   :  { %v2149_v7 = vpop.f32.mrf.mxu1 }
 0xd0c   :  { %4499 = vmatmul.mubr.msk.f32.vlgmr.msra.gmra.mxu1 %vm997_vm11, %v2149_v7 }
 0xd0d   :  { %4502 = vmatpush3.xpose.msk.msra.mxu1 %vm997_vm11, %v2246_v51  ;;  %v4495_v8 = vpop.f32.mrf.mxu1  ;;  %4517 = vmatprep.mubr.msk.f32.mxu1 %vm5295_vm7, %v5293_v62 }
 0xd0e   :  { %4503 = vmatprep.subr.mxu1 %v5293_v62 }
 0xd11   :  { %4504 = vmatpush3.xpose.msk.msra.mxu1 %vm997_vm11, %v2244_v9 }
 0xd12   :  { %4505 = vmatprep.subr.mxu1 %v5293_v62 }
 0xd15   :  { %4506 = vmatpush3.xpose.msk.msra.mxu1 %vm997_vm11, %v2242_v52 }
 0xd16   :  { %4507 = vmatprep.subr.mxu1 %v5293_v62 }
 0xd19   :  { %4508 = vmatpush3.xpose.msk.msra.mxu1 %vm997_vm11, %v2240_v10  ;;  %v2736_v10 = vld [vmem:[#allocation23 + $0x18] sm:$0xff] }
 0xd1a   :  { %4509 = vmatprep.subr.mxu1 %v5293_v62 }
 0xd1d   :  { %4510 = vmatpush3.xpose.msk.msra.mxu1 %vm997_vm11, %v2238_v53 }
 0xd1e   :  { %4511 = vmatprep.subr.mxu1 %v5293_v62 }
 0xd21   :  { %4512 = vmatpush3.xpose.msk.msra.mxu1 %vm997_vm11, %v2236_v11 }
 0xd22   :  { %4513 = vmatprep.subr.mxu1 %v5293_v62 }
 0xd25   :  { %4514 = vmatpush3.xpose.msk.msra.mxu1 %vm997_vm11, %v2234_v55 }
 0xd26   :  { %4515 = vmatprep.subr.mxu1 %v5293_v62 }
 0xd29   :  { %4516 = vmatpush3.xpose.msk.msra.mxu1 %vm997_vm11, %v2232_v12 }
 0xd2a   :  { %4563 = vmatprep.subr.mxu1 %v5293_v62 }
 0xd2c   :  { %4518 = vmatmul.mubr.msk.f32.vlgmr.msra.gmra.mxu1 %vm997_vm11, %v2230_v0 }
 0xd2d   :  { %4579 = vmatprep.mubr.msk.f32.mxu1 %vm5295_vm7, %v5293_v62 }
 0xdcc   :  { %v2224_v15 = vpop.f32.mrf.mxu1 }
 0xdcd   :  { %v5900_v16 = vadd.f32 %v2224_v15, %v1929_v14  ;;  %v3920_v14 = vunpack.c.h.bf16 %v3977_v13  ;;  %v3914_v15 = vld [vmem:[%s2815_s10] sm:$0xff]  }
 0xdce   :  { %v4500_v17 = vpop.f32.mrf.mxu1 }
 0xdcf   :  { %v3919_v17 = vunpack.c.l.bf16 %v3977_v13  ;;  %v3513_v13 = vld [vmem:[%s6178_s20 + $0x60] sm:$0xff] }
 0xdec   :  { %v2331_v18 = vpop.f32.mrf.mxu1 }
 0xded   :  { %v2335_v19 = vmul.f32 0.35355338, %v2331_v18 }
 0xdee   :  { %v4519_v20 = vpop.f32.mrf.mxu1 }
 0xdef   :  { %v2336_v21 = vsel %vm503_vm2, %v2335_v19, -inf  ;;  %v3922_v20 = vld [vmem:[%s2901_s8] sm:$0xff]  }
 0xdf0   :  { %2337 = vmax.xlane.f32.xlu1 %v2336_v21  ;;  %v3915_v21 = vunpack.c.l.bf16 %v3914_v15 }
 0xe01   :  { %2359 = vrot.lane.b32.xlu1 %v5744_v56, %s5297_s26 }
 0xe05   :  { %2357 = vrot.lane.b32.xlu1 %v5748_v57, %s5297_s26 }
 0xe09   :  { %2353 = vrot.lane.b32.xlu1 %v5756_v59, %s5297_s26 }
 0xe0d   :  { %2349 = vrot.lane.b32.xlu1 %v5764_v61, %s5297_s26 }
 0xe11   :  { %2536 = vrot.lane.b32.xlu1 %v5675_v24, %s5298_s30 }
 0xe15   :  { %2532 = vrot.lane.b32.xlu1 %v5682_v27, %s5298_s30 }
 0xe19   :  { %2528 = vrot.lane.b32.xlu1 %v5692_v29, %s5298_s30  ;;  %v2356_v29 = vpop.permute.xlu0 %2355 }
 0xe1d   :  { %2524 = vrot.lane.b32.xlu1 %v5705_v31, %s5298_s30 }
 0xe21   :  { %2520 = vrot.lane.b32.xlu1 %v5736_v44, %s5298_s30 }
 0xe25   :  { %2650 = vrot.lane.b32.xlu1 %v5744_v56, %s5298_s30  ;;  %v2352_v56 = vpop.permute.xlu0 %2351 }
 0xe29   :  { %2646 = vrot.lane.b32.xlu1 %v5752_v58, %s5298_s30 }
 0xe2d   :  { %2642 = vrot.lane.b32.xlu1 %v5760_v60, %s5298_s30 }
 0xe79   :  { %v2338_v24 = vpop.xlane.xlu1 %2337 }
 0xe7a   :  { %v2339_v27 = vsub.f32 %v2335_v19, %v2338_v24  ;;  %v3916_v19 = vunpack.c.h.bf16 %v3914_v15  ;;  %v3924_v24 = vunpack.c.h.bf16 %v3922_v20  ;;  %v3512_v15 = vld [vmem:[%s6178_s20 + $0x58] sm:$0xff] }
 0xe7c   :  { %v2340_v22 = vmul.f32 1.442695, %v2339_v27  ;;  %v3923_v27 = vunpack.c.l.bf16 %v3922_v20  ;;  %v3598_v20 = vld [vmem:[%s5444_s25 + $0x48] sm:$0xff] }
 0xe7d   :  { %v2360_v23 = vpop.permute.xlu1 %2359 }
 0xe7e   :  { %4835 = vpow2.f32 %v2340_v22  ;;  %4523 = vmatpush3.msra.mxu0 %v2360_v23  ;;  %v3979_v22 = vld [vmem:[%s2987_s16 + $0x8] sm:$0xff]  }
 0xe7f   :  { %4524 = vmatprep.subr.mxu0 %v5293_v62  ;;  %v3980_v23 = vld [vmem:[%s3073_s18 + $0x8] sm:$0xff]  }
 0xe81   :  { %v2358_v31 = vpop.permute.xlu1 %2357 }
 0xe82   :  { %4525 = vmatpush3.msra.mxu0 %v2358_v31  ;;  %v3936_v31 = vunpack.c.h.bf16 %v3979_v22 }
 0xe83   :  { %4526 = vmatprep.subr.mxu0 %v5293_v62 }
 0xe84   :  { %4527 = vmatpush3.msra.mxu0 %v2356_v29 }
 0xe85   :  { %4528 = vmatprep.subr.mxu0 %v5293_v62  ;;  %v2354_v44 = vpop.permute.xlu1 %2353 }
 0xe86   :  { %4529 = vmatpush3.msra.mxu0 %v2354_v44 }
 0xe87   :  { %4530 = vmatprep.subr.mxu0 %v5293_v62 }
 0xe88   :  { %4531 = vmatpush3.msra.mxu0 %v2352_v56  ;;  %v3930_v56 = vld [vmem:[%s2987_s16] sm:$0xff]  }
 0xe89   :  { %4532 = vmatprep.subr.mxu0 %v5293_v62  ;;  %v2350_v58 = vpop.permute.xlu1 %2349 }
 0xe8a   :  { %4533 = vmatpush3.msra.mxu0 %v2350_v58 }
 0xe8b   :  { %v4836_v60 = vpop.eup %4835  ;;  %4534 = vmatprep.subr.mxu0 %v5293_v62 }
 0xe8c   :  { %v2342_v25 = vsel %vm503_vm2, %v4836_v60, 0.0 }
 0xe8d   :  { %2343 = vadd.xlane.f32.xlu0 %v2342_v25  ;;  %v3944_v25 = vunpack.c.h.bf16 %v3980_v23 }
 0xea3   :  { %2347 = vrot.lane.b32.xlu0 %v5768_v63, %s5297_s26 }
 0xea7   :  { %2534 = vrot.lane.b32.xlu0 %v5679_v26, %s5298_s30 }
 0xeab   :  { %2530 = vrot.lane.b32.xlu0 %v5687_v28, %s5298_s30  ;;  %v2537_v28 = vpop.permute.xlu1 %2536 }
 0xeaf   :  { %2526 = vrot.lane.b32.xlu0 %v5697_v30, %s5298_s30  ;;  %v2533_v38 = vpop.permute.xlu1 %2532 }
 0xeb3   :  { %2522 = vrot.lane.b32.xlu0 %v5710_v32, %s5298_s30  ;;  %v2529_v40 = vpop.permute.xlu1 %2528 }
 0xeb7   :  { %v2525_v42 = vpop.permute.xlu1 %2524 }
 0xebb   :  { %v2521_v45 = vpop.permute.xlu1 %2520 }
 0xebf   :  { %v2651_v0 = vpop.permute.xlu1 %2650 }
 0xf16   :  { %v2344_v33 = vpop.xlane.xlu0 %2343 }
 0xf17   :  { %4837 = vrcp.f32 %v2344_v33 }
 0xf1a   :  { %v2348_v34 = vpop.permute.xlu0 %2347 }
 0xf1b   :  { %4535 = vmatpush3.msra.mxu0 %v2348_v34  ;;  %v3938_v34 = vld [vmem:[%s3073_s18] sm:$0xff]  }
 0xf1c   :  { %4539 = vmatprep.subr.mxu0 %v5293_v62 }
 0xf1e   :  { %v2535_v32 = vpop.permute.xlu0 %2534 }
 0xf22   :  { %v2531_v39 = vpop.permute.xlu0 %2530 }
 0xf24   :  { %v4838_v35 = vpop.eup %4837 }
 0xf25   :  { %v2346_v36 = vmul.f32 %v4838_v35, %v4836_v60  ;;  %v3935_v60 = vunpack.c.l.bf16 %v3979_v22  ;;  %v3932_v35 = vunpack.c.h.bf16 %v3930_v56  ;;  %v3596_v22 = vld [vmem:[%s5444_s25 + $0x38] sm:$0xff] }
 0xf26   :  { %v2527_v41 = vpop.permute.xlu0 %2526 }
 0xf27   :  { %4537 = vmatmul.mubr.msk.f32.vlgmr.msra.gmra.mxu0 %vm503_vm2, %v2346_v36  ;;  %v3943_v36 = vunpack.c.l.bf16 %v3980_v23  ;;  %v3507_v23 = vld [vmem:[%s6178_s20 + $0x30] sm:$0xff] }
 0xf28   :  { %4540 = vmatpush3.msra.mxu0 %v2445_v37  ;;  %4541 = vmatprep.mubr.msk.f32.mxu0 %vm5295_vm7, %v5293_v62  ;;  %v3931_v37 = vunpack.c.l.bf16 %v3930_v56  ;;  %v3505_v56 = vld [vmem:[%s6178_s20 + $0x20] sm:$0xff] }
 0xf29   :  { %4544 = vmatprep.subr.mxu0 %v5293_v62 }
 0xf2a   :  { %v2523_v43 = vpop.permute.xlu0 %2522 }
 0xfe7   :  { %v2440_v26 = vpop.f32.mrf.mxu0 }
 0xfe8   :  { %4542 = vmatmul.mubr.msk.f32.vlgmr.msra.gmra.mxu0 %vm997_vm11, %v2440_v26  ;;  %v3940_v26 = vunpack.c.h.bf16 %v3938_v34 }
 0xfe9   :  { %4545 = vmatpush3.xpose.msk.msra.mxu0 %vm997_vm11, %v2537_v28  ;;  %v4538_v30 = vpop.f32.mrf.mxu0  ;;  %4560 = vmatprep.mubr.msk.f32.mxu0 %vm5295_vm7, %v5293_v62  ;;  %v3981_v28 = vld [vmem:[%s3159_s22 + $0x8] sm:$0xff]  }
 0xfea   :  { %4546 = vmatprep.subr.mxu0 %v5293_v62  ;;  %v3939_v30 = vunpack.c.l.bf16 %v3938_v34  ;;  %v3591_v34 = vld [vmem:[%s5444_s25 + $0x10] sm:$0xff] }
 0xfed   :  { %4547 = vmatpush3.xpose.msk.msra.mxu0 %vm997_vm11, %v2535_v32 }
 0xfee   :  { %4548 = vmatprep.subr.mxu0 %v5293_v62 }
 0xff1   :  { %4549 = vmatpush3.xpose.msk.msra.mxu0 %vm997_vm11, %v2533_v38  ;;  %v3952_v38 = vunpack.c.h.bf16 %v3981_v28 }
 0xff2   :  { %4550 = vmatprep.subr.mxu0 %v5293_v62 }
 0xff5   :  { %4551 = vmatpush3.xpose.msk.msra.mxu0 %vm997_vm11, %v2531_v39  ;;  %v3982_v39 = vld [vmem:[%s3245_s3 + $0x8] sm:$0xff]  }
 0xff6   :  { %4552 = vmatprep.subr.mxu0 %v5293_v62 }
 0xff9   :  { %4553 = vmatpush3.xpose.msk.msra.mxu0 %vm997_vm11, %v2529_v40  ;;  %v3946_v40 = vld [vmem:[%s3159_s22] sm:$0xff]  }
 0xffa   :  { %4554 = vmatprep.subr.mxu0 %v5293_v62 }
 0xffd   :  { %4555 = vmatpush3.xpose.msk.msra.mxu0 %vm997_vm11, %v2527_v41  ;;  %v3951_v41 = vunpack.c.l.bf16 %v3981_v28 }
 0xffe   :  { %4556 = vmatprep.subr.mxu0 %v5293_v62 }
0x1001   :  { %4557 = vmatpush3.xpose.msk.msra.mxu0 %vm997_vm11, %v2525_v42 }
0x1002   :  { %4558 = vmatprep.subr.mxu0 %v5293_v62 }
0x1005   :  { %4559 = vmatpush3.xpose.msk.msra.mxu0 %vm997_vm11, %v2523_v43  ;;  %v3960_v43 = vunpack.c.h.bf16 %v3982_v39 }
0x1006   :  { %4598 = vmatprep.subr.mxu0 %v5293_v62 }
0x1008   :  { %4561 = vmatmul.mubr.msk.f32.vlgmr.msra.gmra.mxu0 %vm997_vm11, %v2521_v45  ;;  %v3948_v45 = vunpack.c.h.bf16 %v3946_v40 }
0x1009   :  { %4606 = vmatprep.mubr.msk.f32.mxu0 %vm5295_vm7, %v5293_v62 }
0x10a8   :  { %v2515_v46 = vpop.f32.mrf.mxu0 }
0x10a9   :  { %v5972_v47 = vadd.f32 %v2515_v46, %v5900_v16  ;;  %v3954_v46 = vld [vmem:[%s3245_s3] sm:$0xff]  }
0x10aa   :  { %v4543_v48 = vpop.f32.mrf.mxu0 }
0x10ab   :  { %v3947_v48 = vunpack.c.l.bf16 %v3946_v40 }
0x10c8   :  { %v2622_v49 = vpop.f32.mrf.mxu0 }
0x10c9   :  { %v2626_v50 = vmul.f32 0.35355338, %v2622_v49  ;;  %v3956_v49 = vunpack.c.h.bf16 %v3954_v46 }
0x10ca   :  { %v4562_v51 = vpop.f32.mrf.mxu0 }
0x10cb   :  { %v2627_v52 = vsel %vm503_vm2, %v2626_v50, -inf  ;;  %v3955_v51 = vunpack.c.l.bf16 %v3954_v46 }
0x10cc   :  { %2628 = vmax.xlane.f32.xlu0 %v2627_v52 }
0x10e2   :  { %2652 = vrot.lane.b32.xlu0 %v5742_v54, %s5298_s30  ;;  %v2647_v54 = vpop.permute.xlu1 %2646 }
0x10e6   :  { %2648 = vrot.lane.b32.xlu0 %v5748_v57, %s5298_s30 }
0x10ea   :  { %2644 = vrot.lane.b32.xlu0 %v5756_v59, %s5298_s30  ;;  %v2643_v59 = vpop.permute.xlu1 %2642 }
0x10ee   :  { %2640 = vrot.lane.b32.xlu0 %v5764_v61, %s5298_s30 }
0x1155   :  { %v2629_v53 = vpop.xlane.xlu0 %2628 }
0x1156   :  { %v2630_v55 = vsub.f32 %v2626_v50, %v2629_v53  ;;  %v3983_v50 = vld [vmem:[%s3331_s2 + $0x8] sm:$0xff]  }
0x1157   :  { %v3968_v53 = vunpack.c.h.bf16 %v3983_v50 }
0x1158   :  { %v2631_v1 = vmul.f32 1.442695, %v2630_v55  ;;  %v3984_v55 = vld [vmem:[%s3417_s23 + $0x8] sm:$0xff]  }
0x1159   :  { %v2653_v2 = vpop.permute.xlu0 %2652 }
0x115a   :  { %4839 = vpow2.f32 %v2631_v1  ;;  %4564 = vmatpush3.msra.mxu1 %v2653_v2  ;;  %v3967_v1 = vunpack.c.l.bf16 %v3983_v50 }
0x115b   :  { %4565 = vmatprep.subr.mxu1 %v5293_v62 }
0x115c   :  { %4566 = vmatpush3.msra.mxu1 %v2651_v0  ;;  %v3962_v0 = vld [vmem:[%s3331_s2] sm:$0xff]  }
0x115d   :  { %v2649_v3 = vpop.permute.xlu0 %2648  ;;  %4567 = vmatprep.subr.mxu1 %v5293_v62 }
0x115e   :  { %4568 = vmatpush3.msra.mxu1 %v2649_v3  ;;  %v3964_v3 = vunpack.c.h.bf16 %v3962_v0 }
0x115f   :  { %4569 = vmatprep.subr.mxu1 %v5293_v62 }
0x1160   :  { %4570 = vmatpush3.msra.mxu1 %v2647_v54  ;;  %v3976_v54 = vunpack.c.h.bf16 %v3984_v55 }
0x1161   :  { %v2645_v57 = vpop.permute.xlu0 %2644  ;;  %4571 = vmatprep.subr.mxu1 %v5293_v62 }
0x1162   :  { %4572 = vmatpush3.msra.mxu1 %v2645_v57  ;;  %v3970_v57 = vld [vmem:[%s3417_s23] sm:$0xff]  }
0x1163   :  { %4573 = vmatprep.subr.mxu1 %v5293_v62 }
0x1164   :  { %4574 = vmatpush3.msra.mxu1 %v2643_v59  ;;  %v3975_v59 = vunpack.c.l.bf16 %v3984_v55 }
0x1165   :  { %v2641_v61 = vpop.permute.xlu0 %2640  ;;  %4575 = vmatprep.subr.mxu1 %v5293_v62 }
0x1166   :  { %4576 = vmatpush3.msra.mxu1 %v2641_v61  ;;  %v3963_v61 = vunpack.c.l.bf16 %v3962_v0 }
0x1167   :  { %v4840_v4 = vpop.eup %4839  ;;  %4577 = vmatprep.subr.mxu1 %v5293_v62 }
0x1168   :  { %v2633_v5 = vsel %vm503_vm2, %v4840_v4, 0.0 }
0x1169   :  { %2634 = vadd.xlane.f32.xlu1 %v2633_v5  ;;  %v3971_v5 = vunpack.c.l.bf16 %v3970_v57 }
0x117a   :  { %2638 = vrot.lane.b32.xlu1 %v5768_v63, %s5298_s30  ;;  %v3978_v63 = vld [vmem:[%s2901_s8 + $0x8] sm:$0xff]  }
0x117b   :  { %v3928_v11 = vunpack.c.h.bf16 %v3978_v63  ;;  %v3927_v12 = vunpack.c.l.bf16 %v3978_v63  ;;  %v3603_v63 = vld [vmem:[%s5444_s25 + $0x70] sm:$0xff] }
0x117d   :  { %4599 = vmatpush3.msra.mxu0 %v3928_v11  ;;  %v3514_v11 = vld [vmem:[%s6178_s20 + $0x68] sm:$0xff] }
0x117e   :  { %4600 = vmatprep.subr.mxu0 %v5293_v62 }
0x117f   :  { %4601 = vmatpush3.msra.mxu0 %v3927_v12  ;;  %v3602_v12 = vld [vmem:[%s5444_s25 + $0x68] sm:$0xff] }
0x1180   :  { %4602 = vmatprep.subr.mxu0 %v5293_v62 }
0x1181   :  { %4603 = vmatpush3.msra.mxu0 %v3924_v24  ;;  %v3597_v24 = vld [vmem:[%s5444_s25 + $0x40] sm:$0xff] }
0x1182   :  { %4604 = vmatprep.subr.mxu0 %v5293_v62 }
0x1183   :  { %4605 = vmatpush3.msra.mxu0 %v3923_v27  ;;  %v3508_v27 = vld [vmem:[%s6178_s20 + $0x38] sm:$0xff] }
0x1184   :  { %4620 = vmatprep.subr.mxu0 %v5293_v62 }
0x11f2   :  { %v2635_v6 = vpop.xlane.xlu1 %2634 }
0x11f3   :  { %4841 = vrcp.f32 %v2635_v6 }
0x11f6   :  { %v2639_v7 = vpop.permute.xlu1 %2638 }
0x11f7   :  { %4578 = vmatpush3.msra.mxu1 %v2639_v7 }
0x11f8   :  { %4582 = vmatprep.subr.mxu1 %v5293_v62 }
0x1200   :  { %v4842_v8 = vpop.eup %4841 }
0x1201   :  { %v2637_v9 = vmul.f32 %v4842_v8, %v4840_v4  ;;  %v3972_v4 = vunpack.c.h.bf16 %v3970_v57  ;;  %v3516_v8 = vld [vmem:[%s6178_s20 + $0x78] sm:$0xff] }
0x1203   :  { %4580 = vmatmul.mubr.msk.f32.vlgmr.msra.gmra.mxu1 %vm503_vm2, %v2637_v9  ;;  %v3604_v9 = vld [vmem:[%s5444_s25 + $0x78] sm:$0xff] }
0x1204   :  { %4584 = vmatprep.mubr.msk.f32.mxu1 %vm5295_vm7, %v5293_v62  ;;  %4583 = vmatpush3.msra.mxu1 %v2736_v10  ;;  %v3515_v10 = vld [vmem:[%s6178_s20 + $0x70] sm:$0xff] }
0x1205   :  { %4587 = vmatprep.subr.mxu1 %v5293_v62 }
0x12c3   :  { %v2731_v16 = vpop.f32.mrf.mxu1 }
0x12c4   :  { %4585 = vmatmul.mubr.msk.f32.vlgmr.msra.gmra.mxu1 %vm997_vm11, %v2731_v16  ;;  %v3600_v16 = vld [vmem:[%s5444_s25 + $0x58] sm:$0xff] }
0x12c5   :  { %v4581_v18 = vpop.f32.mrf.mxu1  ;;  %4588 = vmatpush3.msra.mxu1 %v3920_v14  ;;  %4595 = vmatprep.mubr.msk.f32.mxu1 %vm5295_vm7, %v5293_v62  ;;  %v3601_v14 = vld [vmem:[%s5444_s25 + $0x60] sm:$0xff] }
0x12c6   :  { %4589 = vmatprep.subr.mxu1 %v5293_v62  ;;  %v3599_v18 = vld [vmem:[%s5444_s25 + $0x50] sm:$0xff] }
0x12c7   :  { %4590 = vmatpush3.msra.mxu1 %v3919_v17  ;;  %v3511_v17 = vld [vmem:[%s6178_s20 + $0x50] sm:$0xff] }
0x12c8   :  { %4591 = vmatprep.subr.mxu1 %v5293_v62 }
0x12c9   :  { %4592 = vmatpush3.msra.mxu1 %v3916_v19  ;;  %v3510_v19 = vld [vmem:[%s6178_s20 + $0x48] sm:$0xff] }
0x12ca   :  { %4593 = vmatprep.subr.mxu1 %v5293_v62 }
0x12cb   :  { %4594 = vmatpush3.msra.mxu1 %v3915_v21  ;;  %v3509_v21 = vld [vmem:[%s6178_s20 + $0x40] sm:$0xff] }
0x12cc   :  { %4609 = vmatprep.subr.mxu1 %v5293_v62 }
0x1384   :  { %v2806_v29 = vpop.f32.mrf.mxu1 }
0x1385   :  { %v6015_v44 = vadd.f32 %v2806_v29, %v5972_v47  ;;  %v3959_v47 = vunpack.c.l.bf16 %v3982_v39  ;;  %v3595_v29 = vld [vmem:[%s5444_s25 + $0x30] sm:$0xff] }
0x1386   :  { %v4586_v58 = vpop.f32.mrf.mxu1  ;;  %v2811_v39 = vld [vmem:[#allocation28] sm:$0x1] }
0x1387   :  { %4596 = vmatmul.mubr.msk.f32.vlgmr.msra.gmra.mxu1 %vm641_vm3, %v6015_v44  ;;  %v2910_v33 = vrot.slane %v6015_v44, 1  ;;  %v2996_v32 = vrot.slane %v6015_v44, 2  ;;  %v3082_v42 = vrot.slane %v6015_v44, 3  ;;  %v3168_v52 = vrot.slane %v6015_v44, 4  ;;  %v3593_v58 = vld [vmem:[%s5444_s25 + $0x20] sm:$0xff] }
0x1388   :  { %4610 = vmatpush3.msra.mxu1 %v3936_v31  ;;  %4617 = vmatprep.mubr.msk.f32.mxu1 %vm5295_vm7, %v5293_v62  ;;  %v3254_v2 = vrot.slane %v6015_v44, 5  ;;  %v3340_v6 = vrot.slane %v6015_v44, 6  ;;  %v3426_v7 = vrot.slane %v6015_v44, 7  ;;  %v3506_v31 = vld [vmem:[%s6178_s20 + $0x28] sm:$0xff] }
0x1389   :  { %4611 = vmatprep.subr.mxu1 %v5293_v62  ;;  %4607 = vmatmul.mubr.msk.f32.vlgmr.msra.gmra.mxu0 %vm641_vm3, %v2910_v33  ;;  %v3594_v44 = vld [vmem:[%s5444_s25 + $0x28] sm:$0xff]  ;;  %v3503_v33 = vld [vmem:[%s6178_s20 + $0x10] sm:$0xff] }
0x138a   :  { %4612 = vmatpush3.msra.mxu1 %v3935_v60  ;;  %4621 = vmatpush3.msra.mxu0 %v3944_v25  ;;  %v3504_v60 = vld [vmem:[%s6178_s20 + $0x18] sm:$0xff] }
0x138b   :  { %4613 = vmatprep.subr.mxu1 %v5293_v62  ;;  %4622 = vmatprep.subr.mxu0 %v5293_v62  ;;  %v3592_v25 = vld [vmem:[%s5444_s25 + $0x18] sm:$0xff] }
0x138c   :  { %4614 = vmatpush3.msra.mxu1 %v3932_v35  ;;  %4623 = vmatpush3.msra.mxu0 %v3943_v36  ;;  %v3502_v35 = vld [vmem:[%s6178_s20 + $0x8] sm:$0xff] }
0x138d   :  { %4615 = vmatprep.subr.mxu1 %v5293_v62  ;;  %4624 = vmatprep.subr.mxu0 %v5293_v62  ;;  %v3590_v36 = vld [vmem:[%s5444_s25 + $0x8] sm:$0xff] }
0x138e   :  { %4616 = vmatpush3.msra.mxu1 %v3931_v37  ;;  %4625 = vmatpush3.msra.mxu0 %v3940_v26  ;;  %v3501_v37 = vld [vmem:[%s6178_s20] sm:$0xff] }
0x138f   :  { %4618 = vmatmul.mubr.msk.f32.vlgmr.msra.gmra.mxu1 %vm641_vm3, %v2996_v32  ;;  %4626 = vmatprep.subr.mxu0 %v5293_v62  ;;  %v3589_v26 = vld [vmem:[%s5444_s25] sm:$0xff]  ;;  %s5299_s25 = smov [#allocation31]  }
0x1390   :  { %4631 = vmatprep.subr.mxu1 %v5293_v62  ;;  %4627 = vmatpush3.msra.mxu0 %v3939_v30  ;;  %s3685_s4 = sshll.u32 %s5299_s25, 4  ;;  %s3686_s4 = int_to_ptr.vmem [resolvable:$true] %s3685_s4 }
0x1391   :  { %4628 = vmatprep.mubr.msk.f32.mxu0 %vm5295_vm7, %v5293_v62  ;;  %4632 = vmatpush3.msra.mxu1 %v3952_v38  ;;  %s5177_s26 = scalar_lea.vmem %s3686_s4, 16  ;;  %s5181_s30 = scalar_lea.vmem %s3686_s4, 32 }
0x1392   :  { %4629 = vmatmul.mubr.msk.f32.vlgmr.msra.gmra.mxu0 %vm641_vm3, %v3082_v42  ;;  %4633 = vmatprep.subr.mxu1 %v5293_v62  ;;  %p5178_p1 = scmp.ne.s32.totalorder %s3686_s4, %s5177_s26  ;;  %p5182_p2 = scmp.lt.s32.totalorder %s3686_s4, %s3686_s4 }
0x1393   :  { %4642 = vmatprep.subr.mxu0 %v5293_v62  ;;  %4634 = vmatpush3.msra.mxu1 %v3951_v41  ;;  %p5183_p3 = scmp.lt.s32.totalorder %s5181_s30, %s5177_s26 }
0x1394   :  { %4643 = vmatpush3.msra.mxu0 %v3960_v43  ;;  %4635 = vmatprep.subr.mxu1 %v5293_v62 }
0x1395   :  { %4644 = vmatprep.subr.mxu0 %v5293_v62  ;;  %4636 = vmatpush3.msra.mxu1 %v3948_v45  ;;  %p5184_p4 = por %p5183_p3, %p5182_p2 }
0x1396   :  { %4645 = vmatpush3.msra.mxu0 %v3959_v47  ;;  %4637 = vmatprep.subr.mxu1 %v5293_v62 }
0x1397   :  { %4646 = vmatprep.subr.mxu0 %v5293_v62  ;;  %4638 = vmatpush3.msra.mxu1 %v3947_v48  ;;  %p5185_p5 = pnand %p5184_p4, %p5178_p1 }
0x1398   :  { %4639 = vmatprep.mubr.msk.f32.mxu1 %vm5295_vm7, %v5293_v62  ;;  %4647 = vmatpush3.msra.mxu0 %v3956_v49 }
0x1399   :  { %4640 = vmatmul.mubr.msk.f32.vlgmr.msra.gmra.mxu1 %vm641_vm3, %v3168_v52  ;;  %4648 = vmatprep.subr.mxu0 %v5293_v62 }
0x139a   :  { %4653 = vmatprep.subr.mxu1 %v5293_v62  ;;  %4649 = vmatpush3.msra.mxu0 %v3955_v51 }
0x139b   :  { %4650 = vmatprep.mubr.msk.f32.mxu0 %vm5295_vm7, %v5293_v62  ;;  %4654 = vmatpush3.msra.mxu1 %v3968_v53 }
0x139c   :  { %4651 = vmatmul.mubr.msk.f32.vlgmr.msra.gmra.mxu0 %vm641_vm3, %v3254_v2  ;;  %4655 = vmatprep.subr.mxu1 %v5293_v62 }
0x139d   :  { %4664 = vmatprep.subr.mxu0 %v5293_v62  ;;  %4656 = vmatpush3.msra.mxu1 %v3967_v1 }
0x139e   :  { %4665 = vmatpush3.msra.mxu0 %v3976_v54  ;;  %4657 = vmatprep.subr.mxu1 %v5293_v62 }
0x139f   :  { %4666 = vmatprep.subr.mxu0 %v5293_v62  ;;  %4658 = vmatpush3.msra.mxu1 %v3964_v3 }
0x13a0   :  { %4667 = vmatpush3.msra.mxu0 %v3975_v59  ;;  %4659 = vmatprep.subr.mxu1 %v5293_v62  ;;  %v3517_v59 = vld [vmem:[#allocation29] sm:$0x1] }
0x13a1   :  { %4668 = vmatprep.subr.mxu0 %v5293_v62  ;;  %4660 = vmatpush3.msra.mxu1 %v3963_v61  ;;  %v3605_v61 = vld [vmem:[#allocation2] sm:$0x1] }
0x13a2   :  { %4661 = vmatprep.mubr.msk.f32.mxu1 %vm5295_vm7, %v5293_v62  ;;  %4669 = vmatpush3.msra.mxu0 %v3972_v4 }
0x13a3   :  { %4662 = vmatmul.mubr.msk.f32.vlgmr.msra.gmra.mxu1 %vm641_vm3, %v3340_v6  ;;  %4670 = vmatprep.subr.mxu0 %v5293_v62 }
0x13a4   :  { %4671 = vmatpush3.msra.mxu0 %v3971_v5  ;;  %4672 = vmatprep.mubr.msk.f32.mxu0 %vm5295_vm7, %v5293_v62 }
0x13a5   :  { %4673 = vmatmul.mubr.msk.f32.vlgmr.msra.gmra.mxu0 %vm641_vm3, %v3426_v7  ;;  %4675 = vmatprep.subr.mxu1 %v5293_v62 }
0x13a6   :  { %4710 = vmatprep.subr.mxu0 %v5293_v62  ;;  %4676 = vmatpush3.msra.mxu1 %v3516_v8 }
0x13a7   :  { %4711 = vmatpush3.msra.mxu0 %v3604_v9  ;;  %4677 = vmatprep.subr.mxu1 %v5293_v62 }
0x13a8   :  { %4712 = vmatprep.subr.mxu0 %v5293_v62  ;;  %4707 = vmatprep.mubr.msk.f32.mxu1 %vm5295_vm7, %v5293_v62 }
0x13a9   :  { %4742 = vmatprep.mubr.msk.f32.mxu0 %vm5295_vm7, %v5293_v62  ;;  %4678 = vmatpush3.msra.mxu1 %v3515_v10 }
0x13aa   :  { %4713 = vmatpush3.msra.mxu0 %v3603_v63  ;;  %4679 = vmatprep.subr.mxu1 %v5293_v62 }
0x13ab   :  { %4714 = vmatprep.subr.mxu0 %v5293_v62  ;;  %4680 = vmatpush3.msra.mxu1 %v3514_v11 }
0x13ac   :  { %4715 = vmatpush3.msra.mxu0 %v3602_v12  ;;  %4681 = vmatprep.subr.mxu1 %v5293_v62 }
0x13ad   :  { %4716 = vmatprep.subr.mxu0 %v5293_v62  ;;  %4682 = vmatpush3.msra.mxu1 %v3513_v13 }
0x13ae   :  { %4717 = vmatpush3.msra.mxu0 %v3601_v14  ;;  %4683 = vmatprep.subr.mxu1 %v5293_v62 }
0x13af   :  { %4718 = vmatprep.subr.mxu0 %v5293_v62  ;;  %4684 = vmatpush3.msra.mxu1 %v3512_v15 }
0x13b0   :  { %4719 = vmatpush3.msra.mxu0 %v3600_v16  ;;  %4685 = vmatprep.subr.mxu1 %v5293_v62 }
0x13b1   :  { %4720 = vmatprep.subr.mxu0 %v5293_v62  ;;  %4686 = vmatpush3.msra.mxu1 %v3511_v17 }
0x13b2   :  { %4721 = vmatpush3.msra.mxu0 %v3599_v18  ;;  %4687 = vmatprep.subr.mxu1 %v5293_v62 }
0x13b3   :  { %4722 = vmatprep.subr.mxu0 %v5293_v62  ;;  %4688 = vmatpush3.msra.mxu1 %v3510_v19 }
0x13b4   :  { %4723 = vmatpush3.msra.mxu0 %v3598_v20  ;;  %4689 = vmatprep.subr.mxu1 %v5293_v62 }
0x13b5   :  { %4724 = vmatprep.subr.mxu0 %v5293_v62  ;;  %4690 = vmatpush3.msra.mxu1 %v3509_v21 }
0x13b6   :  { %4725 = vmatpush3.msra.mxu0 %v3597_v24  ;;  %4691 = vmatprep.subr.mxu1 %v5293_v62 }
0x13b7   :  { %4726 = vmatprep.subr.mxu0 %v5293_v62  ;;  %4692 = vmatpush3.msra.mxu1 %v3508_v27 }
0x13b8   :  { %4727 = vmatpush3.msra.mxu0 %v3596_v22  ;;  %4693 = vmatprep.subr.mxu1 %v5293_v62 }
0x13b9   :  { %4728 = vmatprep.subr.mxu0 %v5293_v62  ;;  %4694 = vmatpush3.msra.mxu1 %v3507_v23 }
0x13ba   :  { %4729 = vmatpush3.msra.mxu0 %v3595_v29  ;;  %4695 = vmatprep.subr.mxu1 %v5293_v62 }
0x13bb   :  { %4730 = vmatprep.subr.mxu0 %v5293_v62  ;;  %4696 = vmatpush3.msra.mxu1 %v3506_v31 }
0x13bc   :  { %4731 = vmatpush3.msra.mxu0 %v3594_v44  ;;  %4697 = vmatprep.subr.mxu1 %v5293_v62 }
0x13bd   :  { %4732 = vmatprep.subr.mxu0 %v5293_v62  ;;  %4698 = vmatpush3.msra.mxu1 %v3505_v56 }
0x13be   :  { %4733 = vmatpush3.msra.mxu0 %v3593_v58  ;;  %4699 = vmatprep.subr.mxu1 %v5293_v62 }
0x13bf   :  { %4734 = vmatprep.subr.mxu0 %v5293_v62  ;;  %4700 = vmatpush3.msra.mxu1 %v3504_v60 }
0x13c0   :  { %4735 = vmatpush3.msra.mxu0 %v3592_v25  ;;  %4701 = vmatprep.subr.mxu1 %v5293_v62 }
0x13c1   :  { %4736 = vmatprep.subr.mxu0 %v5293_v62  ;;  %4702 = vmatpush3.msra.mxu1 %v3503_v33 }
0x13c2   :  { %4737 = vmatpush3.msra.mxu0 %v3591_v34  ;;  %4703 = vmatprep.subr.mxu1 %v5293_v62 }
0x13c3   :  { %4738 = vmatprep.subr.mxu0 %v5293_v62  ;;  %4704 = vmatpush3.msra.mxu1 %v3502_v35 }
0x13c4   :  { %4739 = vmatpush3.msra.mxu0 %v3590_v36  ;;  %4705 = vmatprep.subr.mxu1 %v5293_v62 }
0x13c5   :  { %4740 = vmatprep.subr.mxu0 %v5293_v62  ;;  %4706 = vmatpush3.msra.mxu1 %v3501_v37 }
0x13c6   :  { %4741 = vmatpush3.msra.mxu0 %v3589_v26 }
0x1447   :  { %v2893_v28 = vpop.f32.mrf.mxu1 }
0x1448   :  { %v2897_v42 = vadd.f32 %v2893_v28, %v2811_v39 }
0x1449   :  { %v4597_v30 = vpop.f32.mrf.mxu1  ;;  %v2979_v32 = vpop.f32.mrf.mxu0 }
0x144a   :  { %v2983_v46 = vadd.f32 %v2979_v32, %v2897_v42 }
0x144b   :  { %v4608_v38 = vpop.f32.mrf.mxu0 }
0x144f   :  { %v3065_v40 = vpop.f32.mrf.mxu1 }
0x1450   :  { %v3069_v47 = vadd.f32 %v3065_v40, %v2983_v46 }
0x1451   :  { %v4619_v41 = vpop.f32.mrf.mxu1 }
0x1452   :  { %v3151_v43 = vpop.f32.mrf.mxu0 }
0x1453   :  { %v3155_v50 = vadd.f32 %v3151_v43, %v3069_v47 }
0x1454   :  { %v4630_v45 = vpop.f32.mrf.mxu0 }
0x1459   :  { %v3237_v48 = vpop.f32.mrf.mxu1 }
0x145a   :  { %v3241_v51 = vadd.f32 %v3237_v48, %v3155_v50 }
0x145b   :  { %v4641_v49 = vpop.f32.mrf.mxu1 }
0x145c   :  { %v3323_v62 = vpop.f32.mrf.mxu0 }
0x145d   :  { %v3327_v53 = vadd.f32 %v3323_v62, %v3241_v51 }
0x145e   :  { %v4652_v52 = vpop.f32.mrf.mxu0 }
0x1463   :  { %v3409_v55 = vpop.f32.mrf.mxu1 }
0x1464   :  { %v3413_v0 = vadd.f32 %v3409_v55, %v3327_v53 }
0x1465   :  { %v4663_v1 = vpop.f32.mrf.mxu1  ;;  %v3495_v2 = vpop.f32.mrf.mxu0 }
0x1466   :  { %v3499_v54 = vadd.f32 %v3495_v2, %v3413_v0 }
0x1467   :  { %v4674_v3 = vpop.f32.mrf.mxu0 }
0x1468   :  { %v3500_v57 = vmax.f32 %v3499_v54, 0.0 }
0x146a   :  { %4708 = vmatmul.mubr.f32.vlgmr.msra.gmra.mxu1 %v3500_v57  ;;  %4743 = vmatmul.mubr.f32.vlgmr.msra.gmra.mxu0 %v3500_v57 }
0x152a   :  { %v3584_v4 = vpop.f32.mrf.mxu1  ;;  %v3672_v5 = vpop.f32.mrf.mxu0 }
0x152b   :  { %v3585_v6 = vadd.f32 %v3584_v4, %v3517_v59  ;;  %v3673_v7 = vadd.f32 %v3672_v5, %v3605_v61 }
0x152c   :  { %v4709_v8 = vpop.f32.mrf.mxu1  ;;  %v4744_v9 = vpop.f32.mrf.mxu0 }
0x152d   :  { %3588 = vst [vmem:[#allocation31] sm:$0x1] %v3585_v6  ;;  %4843 = vtanh.f32 %v3673_v7 }
0x152e   :  { %5188 = shalt.err (!%p5185_p5)
}
0x152f   :  { %3688 = dma.vmem_to_hbm [thread:$0]  %s3686_s4, 16, %s5452_s9, [#allocation5]   ;;  %vm3677_vm13 = vcmask 0  }
0x1530   :  { %s5300_s1 = smov [#allocation32]  }
0x1531   :  { %s3695_s27 = sshll.u32 %s5300_s1, 4  ;;  %s3696_s27 = int_to_ptr.vmem [resolvable:$true] %s3695_s27 }
0x1532   :  { %s5197_s8 = scalar_lea.vmem %s3696_s27, 16  ;;  %s5201_s5 = scalar_lea.vmem %s3696_s27, 32 }
0x1533   :  { %p5198_p6 = scmp.ne.s32.totalorder %s3696_s27, %s5197_s8  ;;  %p5202_p7 = scmp.lt.s32.totalorder %s3696_s27, %s3696_s27 }
0x1534   :  { %p5203_p8 = scmp.lt.s32.totalorder %s5201_s5, %s5197_s8 }
0x1536   :  { %p5204_p9 = por %p5203_p8, %p5202_p7 }
0x1538   :  { %p5205_p10 = pnand %p5204_p9, %p5198_p6 }
0x153a   :  { %v4844_v10 = vpop.eup %4843 }
0x153b   :  { %3678 = vst.msk [vmem:[#allocation32] sm:$0x1] %vm3677_vm13, %v4844_v10 }
0x153c   :  { %5208 = shalt.err (!%p5205_p10)
}
0x153d   :  { %3698 = dma.vmem_to_hbm [thread:$0]  %s3696_s27, 16, %s5457_s13, [#allocation33]  }
0x153e   :  { %5237 = dma.done.wait [#allocation5], 16  }
0x153f   :  { %5238 = vsyncadd [#allocation5], 4294967280 }
0x1540   :  { %5239 = dma.done.wait [#allocation33], 16  }
0x1541   :  { %5240 = vsyncadd [#allocation33], 4294967280 }
0x1542   :  { %3705 = vsyncpa [#allocation4], 1 }
0x1543   :  { %3706 = vsyncpa [#allocation9], 1 }
0x1544   :  { %3707 = vsyncpa [#allocation12], 1 }
0x1545   :  { %3708 = vsyncpa [#allocation15], 1 }
0x1546   :  { %3709 = vsyncpa [#allocation18], 1 }
0x1547   :  { %3710 = vsyncpa [#allocation21], 1 }
0x1548   :  { %3711 = vsyncpa [#allocation24], 1 }
0x1549   :  { %3712 = vsyncpa [#allocation27], 1 }
0x154a   :  { %3713 = vsyncpa [#allocation30], 1 }
0x154b   :  { %3714 = vsyncpa [#allocation5], 1 }
0x154c   :  { %3715 = vsyncpa [#allocation33], 1 }
0x154d   :  { %3716 = vsyncpa [#allocation6], 1 }

</bundles_post_ra>
